<compile_context>
chip_gen: v6e
topology: v6e:2x2x1
jax: 0.10.0
libtpu: 0.0.40
codegen_flags: <defaults>
</compile_context>

<pallas_src>
import math

import jax
import jax.numpy as jnp
from jax.experimental import pallas as pl
from jax.experimental.pallas import tpu as pltpu


# ----------------------------- kernel ------------------------------------- #

def _make_fused_mha_kernel(n_head, head_size, cross):
    """Build a fused MHA kernel body for self- or cross-attention."""
    H = head_size
    nhH = n_head * H
    scale = math.sqrt(H)   # matches reference: scores / (1/sqrt(H))

    def kernel(*refs):
        if cross:
            xq_ref, x_ref, wqkv_ref, bqkv_ref, rel_ref, wp_ref, bp_ref, o_ref = refs
        else:
            x_ref, wqkv_ref, bqkv_ref, rel_ref, wp_ref, bp_ref, o_ref = refs
            xq_ref = x_ref

        x = x_ref[0]                                   # (T, D) key/value source
        w_qkv = wqkv_ref[...]                          # (D, 3*n_head*H)
        b_qkv = bqkv_ref[...]                          # (1, 3*n_head*H)

        if cross:
            xq = xq_ref[0]                             # (T, D) query source
            q_all = (jnp.dot(xq, w_qkv[:, :nhH],
                             preferred_element_type=jnp.float32)
                     + b_qkv[:, :nhH])
            kv_all = (jnp.dot(x, w_qkv[:, nhH:],
                              preferred_element_type=jnp.float32)
                      + b_qkv[:, nhH:])
            k_all = kv_all[:, :nhH]
            v_all = kv_all[:, nhH:]
        else:
            # Single wide matmul for Q, K and V of every head.
            qkv = (jnp.dot(x, w_qkv, preferred_element_type=jnp.float32)
                   + b_qkv)                            # (T, 3*n_head*H)
            q_all = qkv[:, :nhH]
            k_all = qkv[:, nhH:2 * nhH]
            v_all = qkv[:, 2 * nhH:]

        head_outs = []
        for h in range(n_head):                        # small static unroll
            q = q_all[:, h * H:(h + 1) * H]            # (T, H)
            k = k_all[:, h * H:(h + 1) * H]            # (T, H)
            v = v_all[:, h * H:(h + 1) * H]            # (T, H)

            # scores / (1/sqrt(H)) == scores * sqrt(H)  (reference semantics)
            scores = jnp.dot(q, k.T,
                             preferred_element_type=jnp.float32) * scale

            rel = rel_ref[h]                           # (T, T, H)
            # einsum('tc,tvc->tv') as an MXU batched contraction:
            # batch over t, contract the head dim (lane axis of both operands).
            rel_scores = jax.lax.dot_general(
                q[:, None, :], rel,
                dimension_numbers=(((2,), (2,)), ((0,), (0,))),
                preferred_element_type=jnp.float32)[:, 0, :]   # (T, T)

            s = scores + rel_scores

            # softmax over keys (f32 VPU/EUP math; divide via EUP reciprocal)
            m = jnp.max(s, axis=-1, keepdims=True)
            e = jnp.exp(s - m)
            inv = pl.reciprocal(jnp.sum(e, axis=-1, keepdims=True), approx=True)
            att = e * inv
            # attention dropout: identity (eval mode)

            head_outs.append(jnp.dot(att, v,
                                     preferred_element_type=jnp.float32))

        cat = jnp.concatenate(head_outs, axis=-1)      # (T, n_head*H)
        out = (jnp.dot(cat, wp_ref[...],
                       preferred_element_type=jnp.float32) + bp_ref[...])
        # output dropout: identity (eval mode)
        o_ref[0] = out.astype(o_ref.dtype)             # lane-dense (T, D) store

    return kernel


# ----------------------------- wrapper ------------------------------------ #

def mha_forward(x, params, dec_x=None):
    (wq, bq, wk, bk, wv, bv, rel, w_proj, b_proj) = params
    B, T, D = x.shape
    n_head, _, _, H = rel.shape
    nhH = n_head * H

    # Pack per-head Q/K/V weights into one (D, 3*n_head*H) matrix so the whole
    # projection is one wide MXU matmul per batch element (head-major columns,
    # matching the torch.cat([...], dim=-1) ordering).
    def pack_w(w):   # (n_head, D, H) -> (D, n_head*H)
        return jnp.transpose(w, (1, 0, 2)).reshape(D, nhH)

    def pack_b(b):   # (n_head, 1, H) -> (1, n_head*H)
        return b.reshape(1, nhH)

    w_qkv = jnp.concatenate([pack_w(wq), pack_w(wk), pack_w(wv)], axis=1)
    b_qkv = jnp.concatenate([pack_b(bq), pack_b(bk), pack_b(bv)], axis=1)

    cross = dec_x is not None
    kernel = _make_fused_mha_kernel(n_head, H, cross)

    x_spec = pl.BlockSpec((1, T, D), lambda b: (b, 0, 0))
    # Grid-invariant operands: constant index_map -> fetched into VMEM once
    # (a few tens of KB total), no per-step re-blocking.
    const_specs = [
        pl.BlockSpec(w_qkv.shape, lambda b: (0, 0)),            # (D, 3*nhH)
        pl.BlockSpec(b_qkv.shape, lambda b: (0, 0)),            # (1, 3*nhH)
        pl.BlockSpec((n_head, T, T, H), lambda b: (0, 0, 0, 0)),  # rel[:, :T, :T]
        pl.BlockSpec(w_proj.shape, lambda b: (0, 0)),           # (nhH, D)
        pl.BlockSpec(b_proj.shape, lambda b: (0, 0)),           # (1, D)
    ]

    if cross:
        in_specs = [x_spec, x_spec] + const_specs       # query source + kv source
        args = (dec_x, x, w_qkv, b_qkv, rel, w_proj, b_proj)
    else:
        in_specs = [x_spec] + const_specs               # x streamed once per batch
        args = (x, w_qkv, b_qkv, rel, w_proj, b_proj)

    # TODO(synk): for realistic T (>> block tile) the (n_head, T, T, H) rel
    # block must be tiled over the key axis (extra grid dim) sized per-chip
    # VMEM (64 MiB on v7x); at this toy block_size it is fully resident.
    return pl.pallas_call(
        kernel,
        out_shape=jax.ShapeDtypeStruct((B, T, D), jnp.float32),
        grid=(B,),
        in_specs=in_specs,
        out_specs=pl.BlockSpec((1, T, D), lambda b: (b, 0, 0)),
        compiler_params=pltpu.CompilerParams(
            dimension_semantics=("parallel",)),
    )(*args)


# ----------------------------- reference ---------------------------------- #

def mha_reference(x, params, dec_x=None):
    (wq, bq, wk, bk, wv, bv, rel, w_proj, b_proj) = params
    B, T, D = x.shape
    n_head, _, _, H = rel.shape
    xq = x if dec_x is None else dec_x
    outs = []
    for h in range(n_head):
        q = xq @ wq[h] + bq[h]
        k = x @ wk[h] + bk[h]
        v = x @ wv[h] + bv[h]
        scores = jnp.einsum('btc,bvc->btv', q, k) * math.sqrt(H)
        rel_scores = jnp.einsum('btc,tvc->btv', q, rel[h, :T, :T])
        att = jax.nn.softmax(scores + rel_scores, axis=-1)
        outs.append(jnp.einsum('btv,bvc->btc', att, v))
    cat = jnp.concatenate(outs, axis=-1)
    return cat @ w_proj + b_proj


# ----------------------------- main ---------------------------------------- #

if __name__ == "__main__":
    # Module hyperparameters (small, consistent with the forward pass).
    d_model = 32
    n_head = 4
    head_size = d_model // n_head      # 8
    block_size = 8                     # max sequence length
    B, T = 2, 8                        # seq_len == block_size here

    key = jax.random.PRNGKey(0)
    ks = jax.random.split(key, 11)

    # Deterministic synthetic parameters (stacked per head).
    wq = 0.1 * jax.random.normal(ks[0], (n_head, d_model, head_size), jnp.float32)
    bq = 0.1 * jax.random.normal(ks[1], (n_head, 1, head_size), jnp.float32)
    wk = 0.1 * jax.random.normal(ks[2], (n_head, d_model, head_size), jnp.float32)
    bk = 0.1 * jax.random.normal(ks[3], (n_head, 1, head_size), jnp.float32)
    wv = 0.1 * jax.random.normal(ks[4], (n_head, d_model, head_size), jnp.float32)
    bv = 0.1 * jax.random.normal(ks[5], (n_head, 1, head_size), jnp.float32)
    rel = jax.random.normal(ks[6], (n_head, block_size, block_size, head_size),
                            jnp.float32)
    w_proj = 0.1 * jax.random.normal(ks[7], (n_head * head_size, d_model),
                                     jnp.float32)
    b_proj = 0.1 * jax.random.normal(ks[8], (1, d_model), jnp.float32)
    params = (wq, bq, wk, bk, wv, bv, rel, w_proj, b_proj)

    x = jax.random.normal(ks[9], (B, T, d_model), jnp.float32)

    out = mha_forward(x, params)
    out = jax.block_until_ready(out)

    ref = mha_reference(x, params)
    assert out.shape == (B, T, d_model)
    assert jnp.all(jnp.isfinite(out))
    assert jnp.allclose(out, ref, atol=2e-2, rtol=2e-2), (
        float(jnp.max(jnp.abs(out - ref))))

    print("KERNEL_OK")
</pallas_src>

<mosaic_0001>
module attributes {stable_mosaic.version = 11 : i64} {
  func.func @kernel(%arg0: i32, %arg1: memref<1x8x32xf32, #tpu.memory_space<vmem>>, %arg2: memref<32x96xf32, #tpu.memory_space<vmem>>, %arg3: memref<1x96xf32, #tpu.memory_space<vmem>>, %arg4: memref<4x8x8x8xf32, #tpu.memory_space<vmem>>, %arg5: memref<32x32xf32, #tpu.memory_space<vmem>>, %arg6: memref<1x32xf32, #tpu.memory_space<vmem>>, %arg7: memref<1x8x32xf32, #tpu.memory_space<vmem>>) attributes {dimension_semantics = [#tpu.dimension_semantics<parallel>], iteration_bounds = array<i64: 2>, scalar_prefetch = 0 : i64, scratch_operands = 0 : i64, tpu.core_type = #tpu.core_type<tc>, window_params = [{transform_indices = @transform_0, window_bounds = array<i64: 1, 8, 32>}, {pipeline_mode = #tpu.pipeline_mode<synchronous>, transform_indices = @transform_1, window_bounds = array<i64: 32, 96>}, {pipeline_mode = #tpu.pipeline_mode<synchronous>, transform_indices = @transform_2, window_bounds = array<i64: 1, 96>}, {pipeline_mode = #tpu.pipeline_mode<synchronous>, transform_indices = @transform_3, window_bounds = array<i64: 4, 8, 8, 8>}, {pipeline_mode = #tpu.pipeline_mode<synchronous>, transform_indices = @transform_4, window_bounds = array<i64: 32, 32>}, {pipeline_mode = #tpu.pipeline_mode<synchronous>, transform_indices = @transform_5, window_bounds = array<i64: 1, 32>}, {transform_indices = @transform_6, window_bounds = array<i64: 1, 8, 32>}]} {
    %c0 = arith.constant 0 : index
    %c0_0 = arith.constant 0 : index
    %c0_1 = arith.constant 0 : index
    %0 = vector.load %arg1[%c0, %c0_0, %c0_1] : memref<1x8x32xf32, #tpu.memory_space<vmem>>, vector<1x8x32xf32>
    %1 = vector.shape_cast %0 : vector<1x8x32xf32> to vector<8x32xf32>
    %c0_2 = arith.constant 0 : index
    %c0_3 = arith.constant 0 : index
    %2 = vector.load %arg2[%c0_2, %c0_3] : memref<32x96xf32, #tpu.memory_space<vmem>>, vector<32x96xf32>
    %c0_4 = arith.constant 0 : index
    %c0_5 = arith.constant 0 : index
    %3 = vector.load %arg3[%c0_4, %c0_5] : memref<1x96xf32, #tpu.memory_space<vmem>>, vector<1x96xf32>
    %cst = arith.constant dense<0.000000e+00> : vector<8x96xf32>
    %4 = tpu.matmul %1, %2, %cst {dimension_numbers = #tpu.dot_dimension_numbers<[1], [0], [0], [1], [0, 0, 1, 1], [], []>} : vector<8x32xf32>, vector<32x96xf32>, vector<8x96xf32> -> vector<8x96xf32>
    %5 = vector.broadcast %3 : vector<1x96xf32> to vector<8x96xf32>
    %6 = arith.addf %4, %5 : vector<8x96xf32>
    %7 = vector.extract_strided_slice %6 {offsets = [0, 0], sizes = [8, 32], strides = [1, 1]} : vector<8x96xf32> to vector<8x32xf32>
    %8 = vector.extract_strided_slice %6 {offsets = [0, 32], sizes = [8, 32], strides = [1, 1]} : vector<8x96xf32> to vector<8x32xf32>
    %9 = vector.extract_strided_slice %6 {offsets = [0, 64], sizes = [8, 32], strides = [1, 1]} : vector<8x96xf32> to vector<8x32xf32>
    %10 = vector.extract_strided_slice %7 {offsets = [0, 0], sizes = [8, 8], strides = [1, 1]} : vector<8x32xf32> to vector<8x8xf32>
    %11 = vector.extract_strided_slice %8 {offsets = [0, 0], sizes = [8, 8], strides = [1, 1]} : vector<8x32xf32> to vector<8x8xf32>
    %12 = vector.extract_strided_slice %9 {offsets = [0, 0], sizes = [8, 8], strides = [1, 1]} : vector<8x32xf32> to vector<8x8xf32>
    %13 = tpu.transpose %11, [1, 0] : vector<8x8xf32> -> vector<8x8xf32>
    %cst_6 = arith.constant dense<0.000000e+00> : vector<8x8xf32>
    %14 = tpu.matmul %10, %13, %cst_6 {dimension_numbers = #tpu.dot_dimension_numbers<[1], [0], [0], [1], [0, 0, 1, 1], [], []>} : vector<8x8xf32>, vector<8x8xf32>, vector<8x8xf32> -> vector<8x8xf32>
    %cst_7 = arith.constant 2.82842708 : f32
    %15 = vector.broadcast %cst_7 : f32 to vector<8x8xf32>
    %16 = arith.mulf %14, %15 : vector<8x8xf32>
    %c0_8 = arith.constant 0 : index
    %c0_9 = arith.constant 0 : index
    %c0_10 = arith.constant 0 : index
    %c0_11 = arith.constant 0 : index
    %17 = vector.load %arg4[%c0_8, %c0_9, %c0_10, %c0_11] : memref<4x8x8x8xf32, #tpu.memory_space<vmem>>, vector<1x8x8x8xf32>
    %18 = vector.shape_cast %17 : vector<1x8x8x8xf32> to vector<8x8x8xf32>
    %19 = vector.shape_cast %10 : vector<8x8xf32> to vector<8x1x8xf32>
    %cst_12 = arith.constant dense<0.000000e+00> : vector<8x1x8xf32>
    %20 = tpu.matmul %19, %18, %cst_12 {dimension_numbers = #tpu.dot_dimension_numbers<[2], [2], [1], [1], [0, 0, 0, 1, 1, 1], [0], [0]>} : vector<8x1x8xf32>, vector<8x8x8xf32>, vector<8x1x8xf32> -> vector<8x1x8xf32>
    %21 = vector.shape_cast %20 : vector<8x1x8xf32> to vector<8x8xf32>
    %22 = arith.addf %16, %21 : vector<8x8xf32>
    %cst_13 = arith.constant dense<0xFF800000> : vector<8xf32>
    %23 = vector.multi_reduction <maximumf>, %22, %cst_13 [1] : vector<8x8xf32> to vector<8xf32>
    %24 = vector.shape_cast %23 : vector<8xf32> to vector<8x1xf32>
    %25 = vector.broadcast %24 : vector<8x1xf32> to vector<8x8xf32>
    %26 = arith.subf %22, %25 : vector<8x8xf32>
    %27 = math.exp %26 : vector<8x8xf32>
    %cst_14 = arith.constant dense<0.000000e+00> : vector<8xf32>
    %28 = vector.multi_reduction <add>, %27, %cst_14 [1] : vector<8x8xf32> to vector<8xf32>
    %29 = vector.shape_cast %28 : vector<8xf32> to vector<8x1xf32>
    %30 = tpu.reciprocal %29 {approx = true} : vector<8x1xf32> -> vector<8x1xf32>
    %31 = vector.broadcast %30 : vector<8x1xf32> to vector<8x8xf32>
    %32 = arith.mulf %27, %31 : vector<8x8xf32>
    %cst_15 = arith.constant dense<0.000000e+00> : vector<8x8xf32>
    %33 = tpu.matmul %32, %12, %cst_15 {dimension_numbers = #tpu.dot_dimension_numbers<[1], [0], [0], [1], [0, 0, 1, 1], [], []>} : vector<8x8xf32>, vector<8x8xf32>, vector<8x8xf32> -> vector<8x8xf32>
    %34 = vector.extract_strided_slice %7 {offsets = [0, 8], sizes = [8, 8], strides = [1, 1]} : vector<8x32xf32> to vector<8x8xf32>
    %35 = vector.extract_strided_slice %8 {offsets = [0, 8], sizes = [8, 8], strides = [1, 1]} : vector<8x32xf32> to vector<8x8xf32>
    %36 = vector.extract_strided_slice %9 {offsets = [0, 8], sizes = [8, 8], strides = [1, 1]} : vector<8x32xf32> to vector<8x8xf32>
    %37 = tpu.transpose %35, [1, 0] : vector<8x8xf32> -> vector<8x8xf32>
    %cst_16 = arith.constant dense<0.000000e+00> : vector<8x8xf32>
    %38 = tpu.matmul %34, %37, %cst_16 {dimension_numbers = #tpu.dot_dimension_numbers<[1], [0], [0], [1], [0, 0, 1, 1], [], []>} : vector<8x8xf32>, vector<8x8xf32>, vector<8x8xf32> -> vector<8x8xf32>
    %cst_17 = arith.constant 2.82842708 : f32
    %39 = vector.broadcast %cst_17 : f32 to vector<8x8xf32>
    %40 = arith.mulf %38, %39 : vector<8x8xf32>
    %c1 = arith.constant 1 : index
    %c0_18 = arith.constant 0 : index
    %c0_19 = arith.constant 0 : index
    %c0_20 = arith.constant 0 : index
    %41 = vector.load %arg4[%c1, %c0_18, %c0_19, %c0_20] : memref<4x8x8x8xf32, #tpu.memory_space<vmem>>, vector<1x8x8x8xf32>
    %42 = vector.shape_cast %41 : vector<1x8x8x8xf32> to vector<8x8x8xf32>
    %43 = vector.shape_cast %34 : vector<8x8xf32> to vector<8x1x8xf32>
    %cst_21 = arith.constant dense<0.000000e+00> : vector<8x1x8xf32>
    %44 = tpu.matmul %43, %42, %cst_21 {dimension_numbers = #tpu.dot_dimension_numbers<[2], [2], [1], [1], [0, 0, 0, 1, 1, 1], [0], [0]>} : vector<8x1x8xf32>, vector<8x8x8xf32>, vector<8x1x8xf32> -> vector<8x1x8xf32>
    %45 = vector.shape_cast %44 : vector<8x1x8xf32> to vector<8x8xf32>
    %46 = arith.addf %40, %45 : vector<8x8xf32>
    %cst_22 = arith.constant dense<0xFF800000> : vector<8xf32>
    %47 = vector.multi_reduction <maximumf>, %46, %cst_22 [1] : vector<8x8xf32> to vector<8xf32>
    %48 = vector.shape_cast %47 : vector<8xf32> to vector<8x1xf32>
    %49 = vector.broadcast %48 : vector<8x1xf32> to vector<8x8xf32>
    %50 = arith.subf %46, %49 : vector<8x8xf32>
    %51 = math.exp %50 : vector<8x8xf32>
    %cst_23 = arith.constant dense<0.000000e+00> : vector<8xf32>
    %52 = vector.multi_reduction <add>, %51, %cst_23 [1] : vector<8x8xf32> to vector<8xf32>
    %53 = vector.shape_cast %52 : vector<8xf32> to vector<8x1xf32>
    %54 = tpu.reciprocal %53 {approx = true} : vector<8x1xf32> -> vector<8x1xf32>
    %55 = vector.broadcast %54 : vector<8x1xf32> to vector<8x8xf32>
    %56 = arith.mulf %51, %55 : vector<8x8xf32>
    %cst_24 = arith.constant dense<0.000000e+00> : vector<8x8xf32>
    %57 = tpu.matmul %56, %36, %cst_24 {dimension_numbers = #tpu.dot_dimension_numbers<[1], [0], [0], [1], [0, 0, 1, 1], [], []>} : vector<8x8xf32>, vector<8x8xf32>, vector<8x8xf32> -> vector<8x8xf32>
    %58 = vector.extract_strided_slice %7 {offsets = [0, 16], sizes = [8, 8], strides = [1, 1]} : vector<8x32xf32> to vector<8x8xf32>
    %59 = vector.extract_strided_slice %8 {offsets = [0, 16], sizes = [8, 8], strides = [1, 1]} : vector<8x32xf32> to vector<8x8xf32>
    %60 = vector.extract_strided_slice %9 {offsets = [0, 16], sizes = [8, 8], strides = [1, 1]} : vector<8x32xf32> to vector<8x8xf32>
    %61 = tpu.transpose %59, [1, 0] : vector<8x8xf32> -> vector<8x8xf32>
    %cst_25 = arith.constant dense<0.000000e+00> : vector<8x8xf32>
    %62 = tpu.matmul %58, %61, %cst_25 {dimension_numbers = #tpu.dot_dimension_numbers<[1], [0], [0], [1], [0, 0, 1, 1], [], []>} : vector<8x8xf32>, vector<8x8xf32>, vector<8x8xf32> -> vector<8x8xf32>
    %cst_26 = arith.constant 2.82842708 : f32
    %63 = vector.broadcast %cst_26 : f32 to vector<8x8xf32>
    %64 = arith.mulf %62, %63 : vector<8x8xf32>
    %c2 = arith.constant 2 : index
    %c0_27 = arith.constant 0 : index
    %c0_28 = arith.constant 0 : index
    %c0_29 = arith.constant 0 : index
    %65 = vector.load %arg4[%c2, %c0_27, %c0_28, %c0_29] : memref<4x8x8x8xf32, #tpu.memory_space<vmem>>, vector<1x8x8x8xf32>
    %66 = vector.shape_cast %65 : vector<1x8x8x8xf32> to vector<8x8x8xf32>
    %67 = vector.shape_cast %58 : vector<8x8xf32> to vector<8x1x8xf32>
    %cst_30 = arith.constant dense<0.000000e+00> : vector<8x1x8xf32>
    %68 = tpu.matmul %67, %66, %cst_30 {dimension_numbers = #tpu.dot_dimension_numbers<[2], [2], [1], [1], [0, 0, 0, 1, 1, 1], [0], [0]>} : vector<8x1x8xf32>, vector<8x8x8xf32>, vector<8x1x8xf32> -> vector<8x1x8xf32>
    %69 = vector.shape_cast %68 : vector<8x1x8xf32> to vector<8x8xf32>
    %70 = arith.addf %64, %69 : vector<8x8xf32>
    %cst_31 = arith.constant dense<0xFF800000> : vector<8xf32>
    %71 = vector.multi_reduction <maximumf>, %70, %cst_31 [1] : vector<8x8xf32> to vector<8xf32>
    %72 = vector.shape_cast %71 : vector<8xf32> to vector<8x1xf32>
    %73 = vector.broadcast %72 : vector<8x1xf32> to vector<8x8xf32>
    %74 = arith.subf %70, %73 : vector<8x8xf32>
    %75 = math.exp %74 : vector<8x8xf32>
    %cst_32 = arith.constant dense<0.000000e+00> : vector<8xf32>
    %76 = vector.multi_reduction <add>, %75, %cst_32 [1] : vector<8x8xf32> to vector<8xf32>
    %77 = vector.shape_cast %76 : vector<8xf32> to vector<8x1xf32>
    %78 = tpu.reciprocal %77 {approx = true} : vector<8x1xf32> -> vector<8x1xf32>
    %79 = vector.broadcast %78 : vector<8x1xf32> to vector<8x8xf32>
    %80 = arith.mulf %75, %79 : vector<8x8xf32>
    %cst_33 = arith.constant dense<0.000000e+00> : vector<8x8xf32>
    %81 = tpu.matmul %80, %60, %cst_33 {dimension_numbers = #tpu.dot_dimension_numbers<[1], [0], [0], [1], [0, 0, 1, 1], [], []>} : vector<8x8xf32>, vector<8x8xf32>, vector<8x8xf32> -> vector<8x8xf32>
    %82 = vector.extract_strided_slice %7 {offsets = [0, 24], sizes = [8, 8], strides = [1, 1]} : vector<8x32xf32> to vector<8x8xf32>
    %83 = vector.extract_strided_slice %8 {offsets = [0, 24], sizes = [8, 8], strides = [1, 1]} : vector<8x32xf32> to vector<8x8xf32>
    %84 = vector.extract_strided_slice %9 {offsets = [0, 24], sizes = [8, 8], strides = [1, 1]} : vector<8x32xf32> to vector<8x8xf32>
    %85 = tpu.transpose %83, [1, 0] : vector<8x8xf32> -> vector<8x8xf32>
    %cst_34 = arith.constant dense<0.000000e+00> : vector<8x8xf32>
    %86 = tpu.matmul %82, %85, %cst_34 {dimension_numbers = #tpu.dot_dimension_numbers<[1], [0], [0], [1], [0, 0, 1, 1], [], []>} : vector<8x8xf32>, vector<8x8xf32>, vector<8x8xf32> -> vector<8x8xf32>
    %cst_35 = arith.constant 2.82842708 : f32
    %87 = vector.broadcast %cst_35 : f32 to vector<8x8xf32>
    %88 = arith.mulf %86, %87 : vector<8x8xf32>
    %c3 = arith.constant 3 : index
    %c0_36 = arith.constant 0 : index
    %c0_37 = arith.constant 0 : index
    %c0_38 = arith.constant 0 : index
    %89 = vector.load %arg4[%c3, %c0_36, %c0_37, %c0_38] : memref<4x8x8x8xf32, #tpu.memory_space<vmem>>, vector<1x8x8x8xf32>
    %90 = vector.shape_cast %89 : vector<1x8x8x8xf32> to vector<8x8x8xf32>
    %91 = vector.shape_cast %82 : vector<8x8xf32> to vector<8x1x8xf32>
    %cst_39 = arith.constant dense<0.000000e+00> : vector<8x1x8xf32>
    %92 = tpu.matmul %91, %90, %cst_39 {dimension_numbers = #tpu.dot_dimension_numbers<[2], [2], [1], [1], [0, 0, 0, 1, 1, 1], [0], [0]>} : vector<8x1x8xf32>, vector<8x8x8xf32>, vector<8x1x8xf32> -> vector<8x1x8xf32>
    %93 = vector.shape_cast %92 : vector<8x1x8xf32> to vector<8x8xf32>
    %94 = arith.addf %88, %93 : vector<8x8xf32>
    %cst_40 = arith.constant dense<0xFF800000> : vector<8xf32>
    %95 = vector.multi_reduction <maximumf>, %94, %cst_40 [1] : vector<8x8xf32> to vector<8xf32>
    %96 = vector.shape_cast %95 : vector<8xf32> to vector<8x1xf32>
    %97 = vector.broadcast %96 : vector<8x1xf32> to vector<8x8xf32>
    %98 = arith.subf %94, %97 : vector<8x8xf32>
    %99 = math.exp %98 : vector<8x8xf32>
    %cst_41 = arith.constant dense<0.000000e+00> : vector<8xf32>
    %100 = vector.multi_reduction <add>, %99, %cst_41 [1] : vector<8x8xf32> to vector<8xf32>
    %101 = vector.shape_cast %100 : vector<8xf32> to vector<8x1xf32>
    %102 = tpu.reciprocal %101 {approx = true} : vector<8x1xf32> -> vector<8x1xf32>
    %103 = vector.broadcast %102 : vector<8x1xf32> to vector<8x8xf32>
    %104 = arith.mulf %99, %103 : vector<8x8xf32>
    %cst_42 = arith.constant dense<0.000000e+00> : vector<8x8xf32>
    %105 = tpu.matmul %104, %84, %cst_42 {dimension_numbers = #tpu.dot_dimension_numbers<[1], [0], [0], [1], [0, 0, 1, 1], [], []>} : vector<8x8xf32>, vector<8x8xf32>, vector<8x8xf32> -> vector<8x8xf32>
    %106 = tpu.concatenate %33, %57, %81, %105 in 1 : vector<8x8xf32>, vector<8x8xf32>, vector<8x8xf32>, vector<8x8xf32> -> vector<8x32xf32>
    %c0_43 = arith.constant 0 : index
    %c0_44 = arith.constant 0 : index
    %107 = vector.load %arg5[%c0_43, %c0_44] : memref<32x32xf32, #tpu.memory_space<vmem>>, vector<32x32xf32>
    %cst_45 = arith.constant dense<0.000000e+00> : vector<8x32xf32>
    %108 = tpu.matmul %106, %107, %cst_45 {dimension_numbers = #tpu.dot_dimension_numbers<[1], [0], [0], [1], [0, 0, 1, 1], [], []>} : vector<8x32xf32>, vector<32x32xf32>, vector<8x32xf32> -> vector<8x32xf32>
    %c0_46 = arith.constant 0 : index
    %c0_47 = arith.constant 0 : index
    %109 = vector.load %arg6[%c0_46, %c0_47] : memref<1x32xf32, #tpu.memory_space<vmem>>, vector<1x32xf32>
    %110 = vector.broadcast %109 : vector<1x32xf32> to vector<8x32xf32>
    %111 = arith.addf %108, %110 : vector<8x32xf32>
    %c0_48 = arith.constant 0 : index
    %c0_49 = arith.constant 0 : index
    %c0_50 = arith.constant 0 : index
    %112 = vector.load %arg7[%c0_48, %c0_49, %c0_50] : memref<1x8x32xf32, #tpu.memory_space<vmem>>, vector<1x8x32xf32>
    %113 = vector.shape_cast %112 : vector<1x8x32xf32> to vector<8x32xf32>
    %114 = vector.shape_cast %111 : vector<8x32xf32> to vector<1x8x32xf32>
    tpu.vector_store %arg7[%c0_48, %c0_49, %c0_50], %114 {strides = array<i32>} : memref<1x8x32xf32, #tpu.memory_space<vmem>>, vector<1x8x32xf32>,
    return
  }
  func.func @transform_0(%arg0: i32) -> (i32, i32, i32) {
    %c0_i32 = arith.constant 0 : i32
    %c0_i32_0 = arith.constant 0 : i32
    %c0_i32_1 = arith.constant 0 : i32
    return %arg0, %c0_i32, %c0_i32_0 : i32, i32, i32
  }
  func.func @transform_1(%arg0: i32) -> (i32, i32) {
    %c0_i32 = arith.constant 0 : i32
    %c0_i32_0 = arith.constant 0 : i32
    %c0_i32_1 = arith.constant 0 : i32
    return %c0_i32, %c0_i32_0 : i32, i32
  }
  func.func @transform_2(%arg0: i32) -> (i32, i32) {
    %c0_i32 = arith.constant 0 : i32
    %c0_i32_0 = arith.constant 0 : i32
    %c0_i32_1 = arith.constant 0 : i32
    return %c0_i32, %c0_i32_0 : i32, i32
  }
  func.func @transform_3(%arg0: i32) -> (i32, i32, i32, i32) {
    %c0_i32 = arith.constant 0 : i32
    %c0_i32_0 = arith.constant 0 : i32
    %c0_i32_1 = arith.constant 0 : i32
    %c0_i32_2 = arith.constant 0 : i32
    %c0_i32_3 = arith.constant 0 : i32
    return %c0_i32, %c0_i32_0, %c0_i32_1, %c0_i32_2 : i32, i32, i32, i32
  }
  func.func @transform_4(%arg0: i32) -> (i32, i32) {
    %c0_i32 = arith.constant 0 : i32
    %c0_i32_0 = arith.constant 0 : i32
    %c0_i32_1 = arith.constant 0 : i32
    return %c0_i32, %c0_i32_0 : i32, i32
  }
  func.func @transform_5(%arg0: i32) -> (i32, i32) {
    %c0_i32 = arith.constant 0 : i32
    %c0_i32_0 = arith.constant 0 : i32
    %c0_i32_1 = arith.constant 0 : i32
    return %c0_i32, %c0_i32_0 : i32, i32
  }
  func.func @transform_6(%arg0: i32) -> (i32, i32, i32) {
    %c0_i32 = arith.constant 0 : i32
    %c0_i32_0 = arith.constant 0 : i32
    %c0_i32_1 = arith.constant 0 : i32
    return %arg0, %c0_i32, %c0_i32_0 : i32, i32, i32
  }
}

</mosaic_0001>

<bundles_post_ra>
// kernel: tpu_custom_call.1
= control target key start
LH: loop header
LB: loop body
LE: loop exit
PB: predicated region body
PF: predicated region fallthrough
CT: control target
= control target key end

     0   :  { %s5262_s0 = inlined_call_operand.hbm [shape: f32[2,8,32], index: 0, kind: input, shape index: {}]   ;;  %s5263_s1 = inlined_call_operand.hbm [shape: f32[32,96], index: 1, kind: input, shape index: {}]   ;;  %s5264_s2 = inlined_call_operand.vmem [shape: f32[1,96], index: 2, kind: input, shape index: {}]   ;;  %s5265_s3 = inlined_call_operand.hbm [shape: f32[4,8,8,8], index: 3, kind: input, shape index: {}]   ;;  %s5266_s4 = inlined_call_operand.hbm [shape: f32[32,32], index: 4, kind: input, shape index: {}]   ;;  %s5267_s5 = inlined_call_operand.vmem [shape: f32[1,32], index: 5, kind: input, shape index: {}]   ;;  %s5268_s6 = inlined_call_operand.hbm [shape: f32[2,8,32], index: 6, kind: output, shape index: {}]  }
   0x1   :  { %5273 = sst [smem:[#allocation15_spill]] %s5263_s1 }
   0x2   :  { %11 = vsyncpa [#allocation3], 0 }
   0x3   :  { %13 = vsyncpa [#allocation3 + $0x1], 0 }
   0x4   :  { %14 = vsyncpa [#allocation6], 0 }
   0x5   :  { %15 = vsyncpa [#allocation9], 0 }
   0x6   :  { %16 = vsyncpa [#allocation4], 0 }
   0x7   :  { %18 = vsyncpa [#allocation4 + $0x1], 0  ;;  %s4704_s21 = smov 0   ;;  %s4706_s22 = smov 0  }
   0x8   :  { %s4708_s23 = smov 0   ;;  %s4710_s24 = smov 0  }
   0x9 LB: > { %s4725_s25 = sadd.s32 4294967295, %s4643_s24   ;;  %s3943_s26 = sadd.s32 4294967294, %s4643_s24   ;;  %s4643_s24 = sphi %s4710_s24, %s5294_s24   ;;  %s4639_s23 = sphi %s4708_s23, %s5293_s23   ;;  %s4635_s22 = sphi %s4706_s22, %s5292_s22   ;;  %s4631_s21 = sphi %s4704_s21, %s5291_s21  }
   0xa   : > { %p44_p0 = scmp.ne.s32.totalorder %s4635_s22, %s4631_s21  ;;  %p5269_p1 = scmp.eq.s32.totalorder %s4725_s25, 0 }
   0xb   : > { %p179_p3 = scmp.eq.s32.totalorder %s3943_s26, 1  ;;  %p3944_p5 = scmp.ge.s32.totalorder %s4643_s24, 1 }
   0xc   : > { %p4734_p4 = por %p5269_p1, %p44_p0  ;;  %p186_p7 = scmp.lt.s32.totalorder %s4643_s24, 3 }
   0xd   : > { %p4739_p6 = por %p179_p3, %p44_p0  ;;  %s4645_s30 = smov [#allocation5]  }
   0xe   : > { %s5274_s27 = scalar_select %p4734_p4, 1, 0 }
   0xf   : > { %s5275_s28 = scalar_select %p4739_p6, 1, 0 }
  0x10   : > { %p4744_p8 = pnand %p3944_p5, %p186_p7  ;;  %s198_s7 = sshll.u32 %s4645_s30, 4  ;;  %s199_s7 = int_to_ptr.vmem [resolvable:$true] %s198_s7 }
  0x11   : > { %s4646_s9 = smov [#allocation7]   ;;  %s4647_s11 = smov [#allocation8]  }
  0x12   : > { %s5276_s29 = scalar_select %p4744_p8, 1, 0 }
  0x13   : > { %p4369_p9 = pneg %p4744_p8  ;;  %s214_s10 = sshll.u32 %s4646_s9, 4  ;;  %s215_s10 = int_to_ptr.vmem [resolvable:$true] %s214_s10 }
  0x14   : > { %s227_s12 = sshll.u32 %s4647_s11, 4  ;;  %s4476_s13 = scalar_lea.vmem %s199_s7, 512  ;;  %s228_s12 = int_to_ptr.vmem [resolvable:$true] %s227_s12 }
  0x15   : > { %p4753_p11 = pnand %p4369_p9, %p5269_p1  ;;  %p4477_p13 = scmp.ne.s32.totalorder %s199_s7, %s4476_s13 }
  0x16   : > { %p4484_p5 = scmp.lt.s32.totalorder %s199_s7, %s199_s7  ;;  %p4485_p7 = scmp.lt.s32.totalorder %s4476_s13, %s4476_s13 }
  0x17   : > { %p4467_p12 = pneg %p4753_p11 }
  0x18   : > { %p4486_p9 = por %p4485_p7, %p4484_p5 }
  0x19   : > { %p4479_p0 = pnand %p4477_p13, %p4467_p12 }
  0x1b   : > { %p4480_p3 = pneg %p4479_p0 }
  0x1d   : > { %p4487_p10 = pnand %p4486_p9, %p4480_p3 }
  0x1f   : > { %4490 = shalt.err (!%p4487_p10)
}
  0x20   : > { %s4648_s14 = smov 128   ;;  %s4649_s15 = smov 8  }
  0x21   : > { %s5278_s1 = sld [smem:[#allocation15_spill]]  ;;  %s4502_s18 = scalar_lea.vmem %s215_s10, 4096 }
  0x22   : > { %p4503_p1 = scmp.ne.s32.totalorder %s215_s10, %s4502_s18  ;;  %p4510_p2 = scmp.lt.s32.totalorder %s215_s10, %s215_s10 }
  0x23   : > { %p4511_p6 = scmp.lt.s32.totalorder %s4502_s18, %s4502_s18 }
  0x24   : > { %p4505_p13 = pnand %p4503_p1, %p4467_p12 }
  0x25   : > { %p4512_p5 = por %p4511_p6, %p4510_p2 }
  0x26   : > { %p4506_p0 = pneg %p4505_p13 }
  0x27   : > { %4372 = dma.hbm_to_vmem [thread:$0]  (!%p4753_p11), %s5278_s1, 512, %s199_s7, [#allocation6], %s4648_s14, %s4648_s14, %s4649_s15  }
  0x28   : > { %p4513_p3 = pnand %p4512_p5, %p4506_p0 }
  0x2a   : > { %4516 = shalt.err (!%p4513_p3)
}
  0x2b   : > { %4375 = dma.hbm_to_vmem [thread:$0]  (!%p4753_p11), %s5265_s3, 4096, %s215_s10, [#allocation6], %s4648_s14, %s4648_s14, %s4649_s15  }
  0x2c   : > { %s4528_s26 = scalar_lea.vmem %s228_s12, 512  ;;  %p4536_p9 = scmp.lt.s32.totalorder %s228_s12, %s228_s12 }
  0x2d   : > { %p4529_p10 = scmp.ne.s32.totalorder %s228_s12, %s4528_s26  ;;  %p4537_p13 = scmp.lt.s32.totalorder %s4528_s26, %s4528_s26 }
  0x2f   : > { %p4531_p7 = pnand %p4529_p10, %p4467_p12  ;;  %p4538_p4 = por %p4537_p13, %p4536_p9 }
  0x31   : > { %p4532_p1 = pneg %p4531_p7 }
  0x33   : > { %p4539_p2 = pnand %p4538_p4, %p4532_p1 }
  0x35   : > { %4542 = shalt.err (!%p4539_p2)
}
  0x36   : > { %4378 = dma.hbm_to_vmem [thread:$0]  (!%p4753_p11), %s5266_s4, 512, %s228_s12, [#allocation9], %s4648_s14, %s4648_s14, %s4649_s15  }
  0x37   : > { %s4784_s9 = sadd.s32 1, %s4643_s24   ;;  %s31_s8 = sadd.s32 1, %s4639_s23 }
  0x38   : > { %s28_s10 = ssub.s32 %s4643_s24, %s4784_s9  ;;  %p38_p6 = scmp.ne.s32.totalorder %s4639_s23, %s4635_s22 }
  0x39   : > { %p29_p4 = scmp.eq.s32.totalorder %s28_s10, 0  ;;  %p39_p12 = scmp.eq.s32.totalorder %s4643_s24, 0 }
  0x3a   : > { %p4390_p0 = scmp.lt.s32.totalorder %s4643_s24, 2  ;;  %p5279_p3 = scmp.eq.s32.totalorder %s4725_s25, 1 }
  0x3b   : > { %s4794_s11 = scalar_select %p29_p4, %s4639_s23, %s31_s8  }
  0x3c   : > { %p40_p5 = por %p39_p12, %p38_p6  ;;  %p4798_p10 = por %p5279_p3, %p38_p6 }
  0x3d   : > { %s244_s16 = sand.u32 1, %s4639_s23   ;;  %s3950_s17 = sshll.u32 %s4643_s24, 7 }
  0x3e   : > { %s5280_s13 = scalar_select %p4798_p10, 1, 0 }
  0x3f   : > { %s3949_s12 = sshll.u32 %s244_s16, 3  ;;  %s4807_s18 = scalar_lea.hbm %s5262_s0, %s3950_s17 }
  0x40   : > { %s248_s19 = scalar_lea.vmem [#allocation2], %s3949_s12  ;;  %p4809_p11 = pnand %p4390_p0, %p40_p5 }
  0x41   : > { %s255_s20 = sshll.u32 %s248_s19, 4  ;;  %s245_s30 = scalar_lea.sflag [#allocation3], %s244_s16  ;;  %s256_s20 = int_to_ptr.vmem [resolvable:$true] %s255_s20 }
  0x42   : > { %s4543_s7 = scalar_lea.hbm %s4807_s18, 128  ;;  %p4545_p1 = pneg %p4809_p11 }
  0x43   : > { %p4544_p7 = scmp.ne.s32.totalorder %s4807_s18, %s4543_s7  ;;  %s4548_s17 = scalar_lea.hbm %s5262_s0, 256 }
  0x44   : > { %p4549_p2 = scmp.lt.s32.totalorder %s4807_s18, %s5262_s0  ;;  %p4550_p4 = scmp.lt.s32.totalorder %s4548_s17, %s4543_s7 }
  0x45   : > { %p4546_p9 = pnand %p4545_p1, %p4544_p7 }
  0x46   : > { %p4551_p6 = por %p4550_p4, %p4549_p2 }
  0x47   : > { %p4547_p13 = pneg %p4546_p9 }
  0x49   : > { %p4552_p12 = pnand %p4551_p6, %p4547_p13 }
  0x4b   : > { %4555 = shalt.err (!%p4552_p12)
}
  0x4c   : > { %s4556_s15 = scalar_lea.vmem %s256_s20, 128  ;;  %s4650_s16 = smov [#allocation2]  }
  0x4d   : > { %p4557_p0 = scmp.ne.s32.totalorder %s256_s20, %s4556_s15  ;;  %s4561_s19 = sshll.u32 %s4650_s16, 4  ;;  %s4562_s19 = int_to_ptr.vmem [resolvable:$false] %s4561_s19 }
  0x4e   : > { %s4563_s1 = scalar_lea.vmem %s4562_s19, 256  ;;  %p4564_p7 = scmp.lt.s32.totalorder %s256_s20, %s4562_s19 }
  0x4f   : > { %p4559_p5 = pnand %p4557_p0, %p4545_p1  ;;  %p4565_p9 = scmp.lt.s32.totalorder %s4563_s1, %s4556_s15 }
  0x51   : > { %p4560_p3 = pneg %p4559_p5  ;;  %p4566_p10 = por %p4565_p9, %p4564_p7 }
  0x53   : > { %p4567_p8 = pnand %p4566_p10, %p4560_p3 }
  0x55   : > { %4570 = shalt.err (!%p4567_p8)
}
  0x56   : > { %4382 = dma.hbm_to_vmem [thread:$0]  (!%p4809_p11), %s4807_s18, 128, %s256_s20, %s245_s30  }
  0x57   : > { %p5282_p13 = scmp.ne.s32.totalorder %s5276_s29, 0 }
  0x58   : > { %s4830_s7 = sand.u32 (!%p5282_p13), 1, %s4635_s22   ;;  %p5283_p10 = scmp.ne.s32.totalorder (!%p5282_p13), %s5274_s27, 0 }
  0x59   : > { %264 = sbr.rel (%p5282_p13) target bundleno = 3053 (0xbed), region = 44  ;;  %s3952_s10 = sshll.u32 (!%p5282_p13), %s4830_s7, 3 }
  0x5a   : > { %s267_s8 = scalar_lea.sflag (!%p5282_p13), [#allocation3], %s4830_s7  ;;  %s270_s1 = scalar_lea.vmem (!%p5282_p13), [#allocation2], %s3952_s10 }
  0x5e   : > { %4614 = dma.done.wait (%p5283_p10), %s267_s8, 128  }
  0x5f   : > { %4616 = vsyncadd (%p5283_p10), %s267_s8, 4294967168  ;;  %p5284_p8 = scmp.eq.s32.totalorder %s4725_s25, 0 }
  0x61   : > { %4618 = dma.done.wait (%p5284_p8), [#allocation6], 4608   ;;  %p5285_p11 = pmov %p5284_p8 }
  0x62   : > { %p5286_p1 = pmov %p5284_p8 }
  0x63   : > { %4620 = vsyncadd (%p5285_p11), [#allocation6], 4294962688 }
  0x64   : > { %4622 = dma.done.wait (%p5286_p1), [#allocation9], 512   ;;  %p5287_p2 = pmov %p5286_p1 }
  0x65   : > { %v4651_v0 = vmov 0.0   ;;  %vm4652_vm0 = vmmov 0   ;;  %v315_v1 = vld [vmem:[#allocation5 + $0x18] sm:$0xff]  ;;  %v314_v2 = vld [vmem:[#allocation5 + $0x10] sm:$0xff]  ;;  %v313_v3 = vld [vmem:[#allocation5 + $0x8] sm:$0xff]  ;;  %vm323_vm1 = vcmask 261120   ;;  %v488_v9 = vlaneseq }
  0x66   : > { %4624 = vsyncadd (%p5287_p2), [#allocation9], 4294966784  ;;  %4131 = vmatprep.subr.mxu0 %v4651_v0  ;;  %4139 = vmatprep.mubr.msk.f32.mxu0 %vm4652_vm0, %v4651_v0  ;;  %v312_v4 = vld [vmem:[#allocation5] sm:$0xff]  ;;  %v311_v5 = vld [vmem:[%s270_s1] sm:$0xff]  ;;  %vm400_vm2 = vcmask 64512   ;;  %s4654_s18 = smov 88  }
  0x67   : > { %4142 = vmatprep.subr.mxu1 %v4651_v0  ;;  %4144 = vmatprep.mubr.msk.f32.mxu1 %vm4652_vm0, %v4651_v0  ;;  %v479_v6 = vld [vmem:[#allocation7 + $0x18] sm:$0xff]  ;;  %v4653_v7 = vmov 1966171168   ;;  %v489_v11 = vshrl.u32 %v488_v9, 7  ;;  %v3957_v12 = vld [vmem:[%s5264_s2] ss:$0 sm:$0xff] }
  0x68   : > { %4132 = vmatpush3.msra.mxu0 %v315_v1  ;;  %v486_v8 = vunpack.c.l.s4 %v4653_v7  ;;  %s4655_s20 = smov 96   ;;  %s4656_s26 = smov 64   ;;  %v481_v25 = vld [vmem:[#allocation7 + $0x28] sm:$0xff]  ;;  %v483_v32 = vld [vmem:[#allocation7 + $0x38] sm:$0xff]  ;;  %v476_v38 = vld [vmem:[#allocation7] sm:$0xff]  ;;  %vm1142_vm3 = vcmask 1041409  }
  0x69   : > { %4133 = vmatprep.subr.mxu0 %v4651_v0  ;;  %v4876_v27 = vsub.s32 0, %v489_v11  ;;  %s4657_s30 = smov 120   ;;  %v477_v40 = vld [vmem:[#allocation7 + $0x8] sm:$0xff]  ;;  %v478_v43 = vld [vmem:[#allocation7 + $0x10] sm:$0xff]  ;;  %v480_v46 = vld [vmem:[#allocation7 + $0x20] sm:$0xff]  ;;  %vm1145_vm4 = vcmask 1042434  }
  0x6a   : > { %4134 = vmatpush3.msra.mxu0 %v314_v2  ;;  %v487_v10 = vunpack.c.0.s8 %v486_v8  ;;  %v1332_v42 = vld [vmem:[#allocation7 + $0x48] sm:$0xff]  ;;  %v1334_v47 = vld [vmem:[#allocation7 + $0x58] sm:$0xff]  ;;  %v482_v49 = vld [vmem:[#allocation7 + $0x30] sm:$0xff]  ;;  %vm1148_vm5 = vcmask 1043459   ;;  %vm1151_vm6 = vcmask 1044484   ;;  %vm1154_vm7 = vcmask 1045509  }
  0x6b   : > { %4135 = vmatprep.subr.mxu0 %v4651_v0  ;;  %vm1157_vm8 = vcmask 1046534   ;;  %vm1160_vm9 = vcmask 1047559   ;;  %s4658_s17 = smov 56   ;;  %s4659_s14 = smov 112   ;;  %vm3741_vm10 = vcmask 130048   ;;  %vm3743_vm11 = vcmask 195584  }
  0x6c   : > { %4136 = vmatpush3.msra.mxu0 %v313_v3  ;;  %v490_v13 = vsub.s32 %v487_v10, %v489_v11  ;;  %s4660_s12 = smov 80   ;;  %s4661_s15 = smov 48  }
  0x6d   : > { %4137 = vmatprep.subr.mxu0 %v4651_v0  ;;  %s4662_s16 = smov 104   ;;  %s4663_s19 = smov 72  }
  0x6e   : > { %4138 = vmatpush3.msra.mxu0 %v312_v4  ;;  %s4664_s8 = smov 40   ;;  %s4665_s1 = smov 16  }
  0x6f   : > { %4140 = vmatmul.mubr.msk.f32.vlgmr.msra.gmra.mxu0 %vm323_vm1, %v311_v5  ;;  %4162 = vmatprep.subr.mxu0 %v4651_v0  ;;  %s4666_s27 = smov 8   ;;  %s4667_s29 = smov 24  }
  0x70   : > { %4164 = vmatprep.mubr.msk.f32.mxu0 %vm4652_vm0, %v4651_v0  ;;  %4163 = vmatpush3.xpose.msk.msra.mxu0 %vm400_vm2, %v479_v6  ;;  %p5288_p6 = scmp.ne.s32.totalorder %s5280_s13, 0 }
  0x71   : > { %4172 = vmatprep.subr.mxu0 %v4651_v0 }
 0x12f   : > { %v393_v14 = vpop.f32.mrf.mxu0 }
 0x130   : > { %v4866_v15 = vadd.f32 %v3957_v12, %v393_v14 }
 0x131   : > { %v4141_v16 = vpop.f32.mrf.mxu0 }
 0x132   : > { %1253 = vrot.lane.b32.xlu1 %v4866_v15, %s4654_s18  ;;  %398 = vrot.lane.b32.xlu0 %v4866_v15, %s4655_s20  ;;  %v491_v17 = vrot.slane %v4866_v15, %v490_v13  ;;  %v484_v18 = vcombine.high %v4866_v15, %v4866_v15 }
 0x134   : > { %v499_v19 = vcombine.high %v491_v17, %v491_v17  ;;  %v498_v20 = vrot.slane %v484_v18, %v490_v13  ;;  %v507_v26 = vrot.slane %v491_v17, %v490_v13 }
 0x136   : > { %1175 = vrot.lane.b32.xlu1 %v4866_v15, %s4656_s26  ;;  %v521_v21 = vrot.slane %v499_v19, %v490_v13  ;;  %v500_v22 = vcombine.high %v498_v20, %v498_v20  ;;  %v4874_v23 = vrot.slane %v498_v20, %v490_v13  ;;  %v4888_v31 = vrot.slane %v507_v26, %v4876_v27  ;;  %s4038_s26 = sshll.u32 %s4725_s25, 7  ;;  %s4668_s25 = smov [#allocation10]  }
 0x137   : > { %v4940_v45 = vcombine.high %v507_v26, %v507_v26 }
 0x138   : > { %v531_v24 = vcombine.high %v521_v21, %v521_v21  ;;  %v528_v28 = vrot.slane %v500_v22, %v490_v13  ;;  %v4901_v34 = vrot.slane %v521_v21, %v4876_v27  ;;  %v4962_v51 = vcombine.high %v4874_v23, %v4874_v23 }
 0x13a   : > { %1251 = vrot.lane.b32.xlu1 %v4866_v15, %s4657_s30  ;;  %4165 = vmatmul.mubr.msk.f32.vlgmr.msra.gmra.mxu0 %vm400_vm2, %v531_v24  ;;  %v532_v29 = vcombine.high %v528_v28, %v528_v28  ;;  %v4882_v30 = vrot.slane %v528_v28, %v4876_v27  ;;  %v4910_v35 = vrot.slane %v531_v24, %v4876_v27 }
 0x13b   : > { %4173 = vmatpush3.xpose.msk.msra.mxu0 %vm400_vm2, %v481_v25  ;;  %4174 = vmatprep.mubr.msk.f32.mxu0 %vm4652_vm0, %v4651_v0 }
 0x13c   : > { %4182 = vmatprep.subr.mxu0 %v4651_v0  ;;  %v4892_v33 = vrot.slane %v532_v29, %v4876_v27 }
 0x13e   : > { %1343 = vrot.lane.b32.xlu1 %v4888_v31, %s4657_s30  ;;  %4175 = vmatmul.mubr.msk.f32.vlgmr.msra.gmra.mxu0 %vm400_vm2, %v528_v28 }
 0x13f   : > { %4183 = vmatpush3.xpose.msk.msra.mxu0 %vm400_vm2, %v483_v32  ;;  %4184 = vmatprep.mubr.msk.f32.mxu0 %vm4652_vm0, %v4651_v0 }
 0x140   : > { %4192 = vmatprep.subr.mxu0 %v4651_v0 }
 0x142   : > { %1424 = vrot.lane.b32.xlu1 %v4901_v34, %s4657_s30  ;;  %4185 = vmatmul.mubr.msk.f32.vlgmr.msra.gmra.mxu0 %vm400_vm2, %v532_v29 }
 0x143   : > { %4194 = vmatprep.mubr.msk.f32.mxu0 %vm4652_vm0, %v4651_v0 }
 0x146   : > { %1586 = vrot.lane.b32.xlu1 %v4910_v35, %s4657_s30 }
 0x1a4   : > { %v1254_v36 = vpop.permute.xlu1 %1253  ;;  %v399_v37 = vpop.permute.xlu0 %398 }
 0x1a5   : > { %4143 = vmatpush3.xpose.msk.msra.mxu1 %vm400_vm2, %v399_v37  ;;  %4193 = vmatpush3.xpose.msk.msra.mxu0 %vm400_vm2, %v1254_v36 }
 0x1a6   : > { %4147 = vmatprep.subr.mxu1 %v4651_v0  ;;  %4202 = vmatprep.subr.mxu0 %v4651_v0 }
 0x1a8   : > { %v1176_v39 = vpop.permute.xlu1 %1175  ;;  %4145 = vmatmul.mubr.msk.f32.vlgmr.msra.gmra.mxu1 %vm400_vm2, %v4866_v15 }
 0x1a9   : > { %4148 = vmatpush3.xpose.msk.msra.mxu1 %vm400_vm2, %v476_v38  ;;  %4149 = vmatprep.mubr.msk.f32.mxu1 %vm4652_vm0, %v4651_v0  ;;  %v4988_v38 = vrot.slane %v4940_v45, %v4876_v27 }
 0x1aa   : > { %4152 = vmatprep.subr.mxu1 %v4651_v0 }
 0x1ac   : > { %v1252_v41 = vpop.permute.xlu1 %1251  ;;  %4150 = vmatmul.mubr.msk.f32.vlgmr.msra.gmra.mxu1 %vm400_vm2, %v507_v26 }
 0x1ad   : > { %4153 = vmatpush3.xpose.msk.msra.mxu1 %vm400_vm2, %v477_v40  ;;  %4195 = vmatmul.mubr.msk.f32.vlgmr.msra.gmra.mxu0 %vm400_vm2, %v1252_v41 }
 0x1ae   : > { %4154 = vmatprep.mubr.msk.f32.mxu1 %vm4652_vm0, %v4651_v0  ;;  %4157 = vmatprep.subr.mxu1 %v4651_v0 }
 0x1af   : > { %4203 = vmatpush3.xpose.msk.msra.mxu0 %vm400_vm2, %v1332_v42  ;;  %4204 = vmatprep.mubr.msk.f32.mxu0 %vm4652_vm0, %v4651_v0 }
 0x1b0   : > { %v4933_v44 = vpop.permute.xlu1 %1343  ;;  %4155 = vmatmul.mubr.msk.f32.vlgmr.msra.gmra.mxu1 %vm400_vm2, %v521_v21  ;;  %4212 = vmatprep.subr.mxu0 %v4651_v0 }
 0x1b1   : > { %4158 = vmatpush3.xpose.msk.msra.mxu1 %vm400_vm2, %v478_v43  ;;  %4159 = vmatprep.mubr.msk.f32.mxu1 %vm4652_vm0, %v4651_v0 }
 0x1b2   : > { %4167 = vmatprep.subr.mxu1 %v4651_v0 }
 0x1b4   : > { %v1425_v48 = vpop.permute.xlu1 %1424  ;;  %4160 = vmatmul.mubr.msk.f32.vlgmr.msra.gmra.mxu1 %vm400_vm2, %v4940_v45  ;;  %v5005_v45 = vrot.slane %v4962_v51, %v4876_v27 }
 0x1b5   : > { %4168 = vmatpush3.xpose.msk.msra.mxu1 %vm400_vm2, %v480_v46  ;;  %4205 = vmatmul.mubr.msk.f32.vlgmr.msra.gmra.mxu0 %vm400_vm2, %v1425_v48  ;;  %v1336_v46 = vld [vmem:[#allocation7 + $0x68] sm:$0xff] }
 0x1b6   : > { %4213 = vmatpush3.xpose.msk.msra.mxu0 %vm400_vm2, %v1334_v47  ;;  %4169 = vmatprep.mubr.msk.f32.mxu1 %vm4652_vm0, %v4651_v0  ;;  %v4996_v47 = vrot.slane %v4874_v23, %v4876_v27 }
 0x1b7   : > { %4177 = vmatprep.subr.mxu1 %v4651_v0  ;;  %4214 = vmatprep.mubr.msk.f32.mxu0 %vm4652_vm0, %v4651_v0 }
 0x1b8   : > { %v1587_v50 = vpop.permute.xlu1 %1586  ;;  %4170 = vmatmul.mubr.msk.f32.vlgmr.msra.gmra.mxu1 %vm400_vm2, %v4874_v23  ;;  %4222 = vmatprep.subr.mxu0 %v4651_v0 }
 0x1b9   : > { %4178 = vmatpush3.xpose.msk.msra.mxu1 %vm400_vm2, %v482_v49  ;;  %4215 = vmatmul.mubr.msk.f32.vlgmr.msra.gmra.mxu0 %vm400_vm2, %v1587_v50  ;;  %v1338_v49 = vld [vmem:[#allocation7 + $0x78] sm:$0xff] }
 0x1ba   : > { %4179 = vmatprep.mubr.msk.f32.mxu1 %vm4652_vm0, %v4651_v0  ;;  %4187 = vmatprep.subr.mxu1 %v4651_v0 }
 0x1bb   : > { %4224 = vmatprep.mubr.msk.f32.mxu0 %vm4652_vm0, %v4651_v0  ;;  %4223 = vmatpush3.xpose.msk.msra.mxu0 %vm400_vm2, %v1336_v46  ;;  %v2183_v46 = vld [vmem:[#allocation7 + $0xa8] sm:$0xff] }
 0x1bc   : > { %4180 = vmatmul.mubr.msk.f32.vlgmr.msra.gmra.mxu1 %vm400_vm2, %v4962_v51  ;;  %4232 = vmatprep.subr.mxu0 %v4651_v0 }
 0x1bd   : > { %4188 = vmatpush3.msra.mxu1 %v1176_v39  ;;  %4189 = vmatprep.mubr.msk.f32.mxu1 %vm4652_vm0, %v4651_v0 }
 0x1be   : > { %4197 = vmatprep.subr.mxu1 %v4651_v0 }
 0x1fa   : > { %v829_v52 = vpop.f32.mrf.mxu0 }
 0x1fb   : > { %v1147_v11 = vrot.slane %v829_v52, 5 }
 0x1fc   : > { %v4166_v53 = vpop.f32.mrf.mxu0 }
 0x1fd   : > { %v1331_v53 = vld [vmem:[#allocation7 + $0x40] sm:$0xff] }
 0x1fe   : > { %v979_v54 = vpop.f32.mrf.mxu0 }
 0x1ff   : > { %v1153_v16 = vrot.slane %v979_v54, 3 }
 0x200   : > { %v4176_v55 = vpop.f32.mrf.mxu0 }
 0x201   : > { %v1333_v55 = vld [vmem:[#allocation7 + $0x50] sm:$0xff] }
 0x202   : > { %v1129_v56 = vpop.f32.mrf.mxu0 }
 0x203   : > { %v1159_v25 = vrot.slane %v1129_v56, 1  ;;  %v1335_v56 = vld [vmem:[#allocation7 + $0x60] sm:$0xff] }
 0x204   : > { %v4186_v57 = vpop.f32.mrf.mxu0 }
 0x268   : > { %v471_v58 = vpop.f32.mrf.mxu1 }
 0x269   : > { %v475_v28 = vmul.f32 2.828427, %v471_v58  ;;  %v1337_v58 = vld [vmem:[#allocation7 + $0x70] sm:$0xff] }
 0x26a   : > { %v4146_v59 = vpop.f32.mrf.mxu1 }
 0x26c   : > { %v604_v60 = vpop.f32.mrf.mxu1 }
 0x26d   : > { %v4972_v61 = vpop.f32.mrf.mxu0 }
 0x26e   : > { %v4151_v62 = vpop.f32.mrf.mxu1 }
 0x26f   : > { %v4196_v63 = vpop.f32.mrf.mxu0 }
 0x270   : > { %v679_v1 = vpop.f32.mrf.mxu1 }
 0x271   : > { %v1141_v2 = vrot.slane %v679_v1, 7 }
 0x272   : > { %v4156_v3 = vpop.f32.mrf.mxu1 }
 0x273   : > { %v1143_v7 = vsel %vm1142_vm3, %v1141_v2, %v604_v60 }
 0x274   : > { %v754_v4 = vpop.f32.mrf.mxu1 }
 0x275   : > { %v1144_v5 = vrot.slane %v754_v4, 6  ;;  %v4974_v6 = vpop.f32.mrf.mxu0 }
 0x276   : > { %v4161_v8 = vpop.f32.mrf.mxu1 }
 0x277   : > { %v1146_v9 = vsel %vm1145_vm4, %v1144_v5, %v1143_v7  ;;  %v4206_v10 = vpop.f32.mrf.mxu0  ;;  %v1995_v5 = vrot.slane %v4974_v6, 7 }
 0x278   : > { %v904_v12 = vpop.f32.mrf.mxu1  ;;  %v1149_v17 = vsel %vm1148_vm5, %v1147_v11, %v1146_v9 }
 0x279   : > { %v1150_v13 = vrot.slane %v904_v12, 4  ;;  %v4978_v14 = vpop.f32.mrf.mxu0 }
 0x27a   : > { %v4171_v18 = vpop.f32.mrf.mxu1  ;;  %v1999_v9 = vrot.slane %v4978_v14, 5  ;;  %v1329_v14 = vmul.f32 2.828427, %v4972_v61 }
 0x27b   : > { %v1152_v19 = vsel %vm1151_vm6, %v1150_v13, %v1149_v17  ;;  %v4216_v20 = vpop.f32.mrf.mxu0 }
 0x27c   : > { %v1054_v21 = vpop.f32.mrf.mxu1  ;;  %v1155_v22 = vsel %vm1154_vm7, %v1153_v16, %v1152_v19 }
 0x27d   : > { %v1156_v24 = vrot.slane %v1054_v21, 2 }
 0x27e   : > { %v4181_v26 = vpop.f32.mrf.mxu1 }
 0x27f   : > { %v1158_v29 = vsel %vm1157_vm8, %v1156_v24, %v1155_v22 }
 0x280   : > { %v1161_v32 = vsel %vm1160_vm9, %v1159_v25, %v1158_v29 }
 0x281   : > { %v1163_v36 = vadd.f32 %v1161_v32, %v475_v28 }
 0x283   : > { %v1164_v37 = vsel %vm400_vm2, %v1163_v36, -inf }
 0x284   : > { %1165 = vmax.xlane.f32.xlu0 %v1164_v37 }
 0x29a   : > { %1505 = vrot.lane.b32.xlu0 %v4988_v38, %s4657_s30 }
 0x30d   : > { %v1166_v39 = vpop.xlane.xlu0 %1165 }
 0x30e   : > { %v1167_v40 = vsub.f32 %v1163_v36, %v1166_v39 }
 0x310   : > { %v1168_v41 = vmul.f32 1.442695, %v1167_v40  ;;  %v2179_v40 = vld [vmem:[#allocation7 + $0x88] sm:$0xff] }
 0x311   : > { %v1506_v57 = vpop.permute.xlu0 %1505 }
 0x312   : > { %4449 = vpow2.f32 %v1168_v41 }
 0x31f   : > { %v4450_v42 = vpop.eup %4449 }
 0x320   : > { %v1170_v43 = vsel %vm400_vm2, %v4450_v42, 0.0 }
 0x321   : > { %1171 = vadd.xlane.f32.xlu1 %v1170_v43 }
 0x332   : > { %1667 = vrot.lane.b32.xlu1 %v4996_v47, %s4657_s30 }
 0x336   : > { %1748 = vrot.lane.b32.xlu1 %v4882_v30, %s4657_s30 }
 0x33a   : > { %1829 = vrot.lane.b32.xlu1 %v5005_v45, %s4657_s30 }
 0x33e   : > { %1910 = vrot.lane.b32.xlu1 %v4892_v33, %s4657_s30  ;;  %s310_s30 = scalar_lea.vmem [#allocation10], %s3952_s10  ;;  %s4575_s10 = sshll.u32 %s4668_s25, 4  ;;  %s4576_s10 = int_to_ptr.vmem [resolvable:$false] %s4575_s10 }
 0x342   : > { %2022 = vrot.lane.b32.xlu1 %v4866_v15, %s4658_s17  ;;  %s3844_s17 = sshll.u32 %s310_s30, 4  ;;  %s3845_s17 = int_to_ptr.vmem [resolvable:$true] %s3844_s17 }
 0x343   : > { %p4578_p5 = scmp.lt.s32.totalorder %s3845_s17, %s4576_s10 }
 0x346   : > { %2186 = vrot.lane.b32.xlu1 %v4888_v31, %s4659_s14 }
 0x3aa   : > { %v1172_v23 = vpop.xlane.xlu1 %1171 }
 0x3ab   : > { %4451 = vrcp.f32 %v1172_v23 }
 0x3ae   : > { %v1668_v48 = vpop.permute.xlu1 %1667 }
 0x3b2   : > { %v1749_v50 = vpop.permute.xlu1 %1748 }
 0x3b3   : > { %4225 = vmatmul.mubr.msk.f32.vlgmr.msra.gmra.mxu0 %vm400_vm2, %v1749_v50  ;;  %v2185_v50 = vld [vmem:[#allocation7 + $0xb8] sm:$0xff] }
 0x3b4   : > { %4233 = vmatpush3.xpose.msk.msra.mxu0 %vm400_vm2, %v1338_v49  ;;  %4234 = vmatprep.mubr.msk.f32.mxu0 %vm4652_vm0, %v4651_v0 }
 0x3b5   : > { %4242 = vmatprep.subr.mxu0 %v4651_v0 }
 0x3b6   : > { %v1830_v27 = vpop.permute.xlu1 %1829 }
 0x3b8   : > { %v4452_v51 = vpop.eup %4451 }
 0x3b9   : > { %v1174_v52 = vmul.f32 %v4452_v51, %v4450_v42  ;;  %v2181_v42 = vld [vmem:[#allocation7 + $0x98] sm:$0xff] }
 0x3ba   : > { %v1911_v54 = vpop.permute.xlu1 %1910 }
 0x3bb   : > { %4190 = vmatmul.mubr.msk.f32.vlgmr.msra.gmra.mxu1 %vm400_vm2, %v1174_v52  ;;  %4235 = vmatmul.mubr.msk.f32.vlgmr.msra.gmra.mxu0 %vm400_vm2, %v1911_v54 }
 0x3bc   : > { %4198 = vmatpush3.xpose.msk.msra.mxu1 %vm400_vm2, %v1331_v53  ;;  %4199 = vmatprep.mubr.msk.f32.mxu1 %vm4652_vm0, %v4651_v0 }
 0x3bd   : > { %4207 = vmatprep.subr.mxu1 %v4651_v0  ;;  %4244 = vmatprep.mubr.msk.f32.mxu0 %vm4652_vm0, %v4651_v0 }
 0x3bf   : > { %4200 = vmatmul.mubr.msk.f32.vlgmr.msra.gmra.mxu1 %vm400_vm2, %v4933_v44  ;;  %v2023_v44 = vpop.permute.xlu1 %2022 }
 0x3c0   : > { %4208 = vmatpush3.xpose.msk.msra.mxu1 %vm400_vm2, %v1333_v55  ;;  %4209 = vmatprep.mubr.msk.f32.mxu1 %vm4652_vm0, %v4651_v0 }
 0x3c1   : > { %4217 = vmatprep.subr.mxu1 %v4651_v0 }
 0x3c3   : > { %4210 = vmatmul.mubr.msk.f32.vlgmr.msra.gmra.mxu1 %vm400_vm2, %v1506_v57  ;;  %v2187_v52 = vpop.permute.xlu1 %2186  ;;  %v2180_v57 = vld [vmem:[#allocation7 + $0x90] sm:$0xff] }
 0x3c4   : > { %4218 = vmatpush3.xpose.msk.msra.mxu1 %vm400_vm2, %v1335_v56  ;;  %4219 = vmatprep.mubr.msk.f32.mxu1 %vm4652_vm0, %v4651_v0  ;;  %v2178_v56 = vld [vmem:[#allocation7 + $0x80] sm:$0xff] }
 0x3c5   : > { %4227 = vmatprep.subr.mxu1 %v4651_v0 }
 0x3c7   : > { %4220 = vmatmul.mubr.msk.f32.vlgmr.msra.gmra.mxu1 %vm400_vm2, %v1668_v48 }
 0x3c8   : > { %4228 = vmatpush3.xpose.msk.msra.mxu1 %vm400_vm2, %v1337_v58  ;;  %4229 = vmatprep.mubr.msk.f32.mxu1 %vm4652_vm0, %v4651_v0 }
 0x3c9   : > { %4237 = vmatprep.subr.mxu1 %v4651_v0 }
 0x3cb   : > { %4230 = vmatmul.mubr.msk.f32.vlgmr.msra.gmra.mxu1 %vm400_vm2, %v1830_v27 }
 0x3cc   : > { %4238 = vmatpush3.msra.mxu1 %v2023_v44  ;;  %4239 = vmatprep.mubr.msk.f32.mxu1 %vm4652_vm0, %v4651_v0  ;;  %v2182_v44 = vld [vmem:[#allocation7 + $0xa0] sm:$0xff] }
 0x3cd   : > { %4247 = vmatprep.subr.mxu1 %v4651_v0 }
 0x473   : > { %v1821_v59 = vpop.f32.mrf.mxu0 }
 0x474   : > { %v2003_v20 = vrot.slane %v1821_v59, 3 }
 0x475   : > { %v4226_v60 = vpop.f32.mrf.mxu0 }
 0x476   : > { %v2184_v60 = vld [vmem:[#allocation7 + $0xb0] sm:$0xff] }
 0x47b   : > { %v5047_v62 = vpop.f32.mrf.mxu1  ;;  %v1983_v63 = vpop.f32.mrf.mxu0 }
 0x47c   : > { %v2007_v6 = vrot.slane %v1983_v63, 1 }
 0x47d   : > { %v4191_v1 = vpop.f32.mrf.mxu1  ;;  %v4236_v2 = vpop.f32.mrf.mxu0 }
 0x47f   : > { %v1416_v3 = vpop.f32.mrf.mxu1 }
 0x480   : > { %v1996_v10 = vsel %vm1142_vm3, %v1995_v5, %v1416_v3 }
 0x481   : > { %v4201_v4 = vpop.f32.mrf.mxu1 }
 0x483   : > { %v1578_v7 = vpop.f32.mrf.mxu1 }
 0x484   : > { %v1997_v8 = vrot.slane %v1578_v7, 6 }
 0x485   : > { %v4211_v11 = vpop.f32.mrf.mxu1 }
 0x486   : > { %v1998_v12 = vsel %vm1145_vm4, %v1997_v8, %v1996_v10 }
 0x487   : > { %v1740_v13 = vpop.f32.mrf.mxu1  ;;  %v2000_v16 = vsel %vm1148_vm5, %v1999_v9, %v1998_v12 }
 0x488   : > { %v2001_v17 = vrot.slane %v1740_v13, 4 }
 0x489   : > { %v4221_v18 = vpop.f32.mrf.mxu1 }
 0x48a   : > { %v2002_v19 = vsel %vm1151_vm6, %v2001_v17, %v2000_v16 }
 0x48b   : > { %v1902_v21 = vpop.f32.mrf.mxu1  ;;  %v2004_v24 = vsel %vm1154_vm7, %v2003_v20, %v2002_v19 }
 0x48c   : > { %v2005_v22 = vrot.slane %v1902_v21, 2 }
 0x48d   : > { %v4231_v25 = vpop.f32.mrf.mxu1 }
 0x48e   : > { %v2006_v26 = vsel %vm1157_vm8, %v2005_v22, %v2004_v24 }
 0x48f   : > { %v2008_v28 = vsel %vm1160_vm9, %v2007_v6, %v2006_v26 }
 0x490   : > { %v2010_v29 = vadd.f32 %v2008_v28, %v1329_v14 }
 0x492   : > { %v2011_v32 = vsel %vm400_vm2, %v2010_v29, -inf }
 0x493   : > { %2012 = vmax.xlane.f32.xlu0 %v2011_v32 }
 0x4a9   : > { %2100 = vrot.lane.b32.xlu0 %v4866_v15, %s4660_s12 }
 0x4ad   : > { %2098 = vrot.lane.b32.xlu0 %v4866_v15, %s4659_s14 }
 0x4b1   : > { %2263 = vrot.lane.b32.xlu0 %v4901_v34, %s4659_s14 }
 0x4b5   : > { %2417 = vrot.lane.b32.xlu0 %v4910_v35, %s4659_s14 }
 0x4b9   : > { %2571 = vrot.lane.b32.xlu0 %v4882_v30, %s4659_s14 }
 0x4bd   : > { %2725 = vrot.lane.b32.xlu0 %v4892_v33, %s4659_s14 }
 0x51c   : > { %v2013_v61 = vpop.xlane.xlu0 %2012 }
 0x51d   : > { %v2014_v36 = vsub.f32 %v2010_v29, %v2013_v61 }
 0x51f   : > { %v2015_v37 = vmul.f32 1.442695, %v2014_v36 }
 0x520   : > { %v2101_v39 = vpop.permute.xlu0 %2100 }
 0x521   : > { %4453 = vpow2.f32 %v2015_v37  ;;  %4243 = vmatpush3.xpose.msk.msra.mxu0 %vm400_vm2, %v2101_v39 }
 0x522   : > { %4252 = vmatprep.subr.mxu0 %v4651_v0 }
 0x524   : > { %v2099_v41 = vpop.permute.xlu0 %2098 }
 0x525   : > { %4245 = vmatmul.mubr.msk.f32.vlgmr.msra.gmra.mxu0 %vm400_vm2, %v2099_v41 }
 0x526   : > { %4253 = vmatpush3.xpose.msk.msra.mxu0 %vm400_vm2, %v2179_v40  ;;  %4254 = vmatprep.mubr.msk.f32.mxu0 %vm4652_vm0, %v4651_v0 }
 0x527   : > { %4262 = vmatprep.subr.mxu0 %v4651_v0 }
 0x528   : > { %v2264_v43 = vpop.permute.xlu0 %2263 }
 0x529   : > { %4255 = vmatmul.mubr.msk.f32.vlgmr.msra.gmra.mxu0 %vm400_vm2, %v2264_v43 }
 0x52a   : > { %4263 = vmatpush3.xpose.msk.msra.mxu0 %vm400_vm2, %v2181_v42  ;;  %4264 = vmatprep.mubr.msk.f32.mxu0 %vm4652_vm0, %v4651_v0 }
 0x52b   : > { %4272 = vmatprep.subr.mxu0 %v4651_v0 }
 0x52c   : > { %v2418_v23 = vpop.permute.xlu0 %2417 }
 0x52d   : > { %4265 = vmatmul.mubr.msk.f32.vlgmr.msra.gmra.mxu0 %vm400_vm2, %v2418_v23 }
 0x52e   : > { %v4454_v48 = vpop.eup %4453  ;;  %4273 = vmatpush3.xpose.msk.msra.mxu0 %vm400_vm2, %v2183_v46  ;;  %4274 = vmatprep.mubr.msk.f32.mxu0 %vm4652_vm0, %v4651_v0 }
 0x52f   : > { %v2017_v49 = vsel %vm400_vm2, %v4454_v48, 0.0  ;;  %4282 = vmatprep.subr.mxu0 %v4651_v0 }
 0x530   : > { %2018 = vadd.xlane.f32.xlu1 %v2017_v49  ;;  %v2572_v27 = vpop.permute.xlu0 %2571 }
 0x531   : > { %4275 = vmatmul.mubr.msk.f32.vlgmr.msra.gmra.mxu0 %vm400_vm2, %v2572_v27 }
 0x532   : > { %4283 = vmatpush3.xpose.msk.msra.mxu0 %vm400_vm2, %v2185_v50  ;;  %4284 = vmatprep.mubr.msk.f32.mxu0 %vm4652_vm0, %v4651_v0 }
 0x533   : > { %4292 = vmatprep.subr.mxu0 %v4651_v0 }
 0x534   : > { %v2726_v51 = vpop.permute.xlu0 %2725 }
 0x535   : > { %4285 = vmatmul.mubr.msk.f32.vlgmr.msra.gmra.mxu0 %vm400_vm2, %v2726_v51 }
 0x536   : > { %4294 = vmatprep.mubr.msk.f32.mxu0 %vm4652_vm0, %v4651_v0 }
 0x541   : > { %2340 = vrot.lane.b32.xlu1 %v4988_v38, %s4659_s14 }
 0x545   : > { %2494 = vrot.lane.b32.xlu1 %v4996_v47, %s4659_s14 }
 0x549   : > { %2648 = vrot.lane.b32.xlu1 %v5005_v45, %s4659_s14 }
 0x5b9   : > { %v2019_v53 = vpop.xlane.xlu1 %2018 }
 0x5ba   : > { %4455 = vrcp.f32 %v2019_v53  ;;  %v2994_v53 = vld [vmem:[#allocation7 + $0xc8] sm:$0xff] }
 0x5bd   : > { %v2341_v58 = vpop.permute.xlu1 %2340 }
 0x5c1   : > { %v2495_v59 = vpop.permute.xlu1 %2494 }
 0x5c5   : > { %v2649_v63 = vpop.permute.xlu1 %2648 }
 0x5c7   : > { %v4456_v54 = vpop.eup %4455 }
 0x5c8   : > { %v2021_v55 = vmul.f32 %v4456_v54, %v4454_v48  ;;  %v2998_v54 = vld [vmem:[#allocation7 + $0xe8] sm:$0xff] }
 0x5ca   : > { %4240 = vmatmul.mubr.msk.f32.vlgmr.msra.gmra.mxu1 %vm400_vm2, %v2021_v55 }
 0x5cb   : > { %4248 = vmatpush3.xpose.msk.msra.mxu1 %vm400_vm2, %v2178_v56  ;;  %4249 = vmatprep.mubr.msk.f32.mxu1 %vm4652_vm0, %v4651_v0  ;;  %v2993_v56 = vld [vmem:[#allocation7 + $0xc0] sm:$0xff] }
 0x5cc   : > { %4257 = vmatprep.subr.mxu1 %v4651_v0 }
 0x5ce   : > { %4250 = vmatmul.mubr.msk.f32.vlgmr.msra.gmra.mxu1 %vm400_vm2, %v2187_v52 }
 0x5cf   : > { %4258 = vmatpush3.xpose.msk.msra.mxu1 %vm400_vm2, %v2180_v57  ;;  %4259 = vmatprep.mubr.msk.f32.mxu1 %vm4652_vm0, %v4651_v0 }
 0x5d0   : > { %4267 = vmatprep.subr.mxu1 %v4651_v0 }
 0x5d2   : > { %4260 = vmatmul.mubr.msk.f32.vlgmr.msra.gmra.mxu1 %vm400_vm2, %v2341_v58  ;;  %v3000_v58 = vld [vmem:[#allocation7 + $0xf8] sm:$0xff] }
 0x5d3   : > { %4268 = vmatpush3.xpose.msk.msra.mxu1 %vm400_vm2, %v2182_v44  ;;  %4269 = vmatprep.mubr.msk.f32.mxu1 %vm4652_vm0, %v4651_v0  ;;  %v2995_v44 = vld [vmem:[#allocation7 + $0xd0] sm:$0xff] }
 0x5d4   : > { %4277 = vmatprep.subr.mxu1 %v4651_v0 }
 0x5d6   : > { %4270 = vmatmul.mubr.msk.f32.vlgmr.msra.gmra.mxu1 %vm400_vm2, %v2495_v59 }
 0x5d7   : > { %4278 = vmatpush3.xpose.msk.msra.mxu1 %vm400_vm2, %v2184_v60  ;;  %4279 = vmatprep.mubr.msk.f32.mxu1 %vm4652_vm0, %v4651_v0 }
 0x5d8   : > { %4287 = vmatprep.subr.mxu1 %v4651_v0 }
 0x5da   : > { %4280 = vmatmul.mubr.msk.f32.vlgmr.msra.gmra.mxu1 %vm400_vm2, %v2649_v63  ;;  %v2997_v63 = vld [vmem:[#allocation7 + $0xe0] sm:$0xff] }
 0x5db   : > { %4289 = vmatprep.mubr.msk.f32.mxu1 %vm4652_vm0, %v4651_v0 }
 0x5e5   : > { %v2172_v1 = vpop.f32.mrf.mxu0 }
 0x5e6   : > { %v2176_v41 = vmul.f32 2.828427, %v2172_v1 }
 0x5e7   : > { %v4246_v2 = vpop.f32.mrf.mxu0 }
 0x5e8   : > { %v2999_v2 = vld [vmem:[#allocation7 + $0xf0] sm:$0xff] }
 0x5e9   : > { %v2336_v3 = vpop.f32.mrf.mxu0 }
 0x5ea   : > { %v2810_v18 = vrot.slane %v2336_v3, 7 }
 0x5eb   : > { %v4256_v4 = vpop.f32.mrf.mxu0 }
 0x5ed   : > { %v2490_v5 = vpop.f32.mrf.mxu0 }
 0x5ee   : > { %v2814_v21 = vrot.slane %v2490_v5, 5 }
 0x5ef   : > { %v4266_v7 = vpop.f32.mrf.mxu0 }
 0x5f1   : > { %v2644_v8 = vpop.f32.mrf.mxu0 }
 0x5f2   : > { %v2818_v28 = vrot.slane %v2644_v8, 3 }
 0x5f3   : > { %v4276_v9 = vpop.f32.mrf.mxu0 }
 0x5f5   : > { %v2798_v10 = vpop.f32.mrf.mxu0 }
 0x5f6   : > { %v2822_v39 = vrot.slane %v2798_v10, 1 }
 0x5f7   : > { %v4286_v11 = vpop.f32.mrf.mxu0 }
 0x68a   : > { %v5126_v12 = vpop.f32.mrf.mxu1 }
 0x68c   : > { %v4241_v13 = vpop.f32.mrf.mxu1 }
 0x68e   : > { %v2259_v16 = vpop.f32.mrf.mxu1 }
 0x68f   : > { %v2811_v22 = vsel %vm1142_vm3, %v2810_v18, %v2259_v16 }
 0x690   : > { %v4251_v17 = vpop.f32.mrf.mxu1 }
 0x692   : > { %v2413_v19 = vpop.f32.mrf.mxu1 }
 0x693   : > { %v2812_v20 = vrot.slane %v2413_v19, 6 }
 0x694   : > { %v4261_v6 = vpop.f32.mrf.mxu1 }
 0x695   : > { %v2813_v24 = vsel %vm1145_vm4, %v2812_v20, %v2811_v22 }
 0x696   : > { %v2567_v25 = vpop.f32.mrf.mxu1  ;;  %v2815_v14 = vsel %vm1148_vm5, %v2814_v21, %v2813_v24 }
 0x697   : > { %v2816_v26 = vrot.slane %v2567_v25, 4 }
 0x698   : > { %v4271_v29 = vpop.f32.mrf.mxu1 }
 0x699   : > { %v2817_v32 = vsel %vm1151_vm6, %v2816_v26, %v2815_v14 }
 0x69a   : > { %v2721_v61 = vpop.f32.mrf.mxu1  ;;  %v2819_v36 = vsel %vm1154_vm7, %v2818_v28, %v2817_v32 }
 0x69b   : > { %v2820_v37 = vrot.slane %v2721_v61, 2 }
 0x69c   : > { %v4281_v40 = vpop.f32.mrf.mxu1 }
 0x69d   : > { %v2821_v42 = vsel %vm1157_vm8, %v2820_v37, %v2819_v36 }
 0x69e   : > { %v2823_v43 = vsel %vm1160_vm9, %v2822_v39, %v2821_v42 }
 0x69f   : > { %v2825_v46 = vadd.f32 %v2823_v43, %v2176_v41 }
 0x6a1   : > { %v2826_v23 = vsel %vm400_vm2, %v2825_v46, -inf }
 0x6a2   : > { %2827 = vmax.xlane.f32.xlu1 %v2826_v23 }
 0x6b3   : > { %2837 = vrot.lane.b32.xlu1 %v4866_v15, %s4661_s15  ;;  %s5224_s15 = scalar_lea.hbm %s5268_s6, %s4038_s26 }
 0x6b7   : > { %2913 = vrot.lane.b32.xlu1 %v4866_v15, %s4662_s16 }
 0x6bb   : > { %3078 = vrot.lane.b32.xlu1 %v4901_v34, %s4662_s16 }
 0x6bf   : > { %3232 = vrot.lane.b32.xlu1 %v4910_v35, %s4662_s16 }
 0x6c3   : > { %3386 = vrot.lane.b32.xlu1 %v4882_v30, %s4662_s16 }
 0x6c7   : > { %3540 = vrot.lane.b32.xlu1 %v4892_v33, %s4662_s16 }
 0x72b   : > { %v2828_v48 = vpop.xlane.xlu1 %2827 }
 0x72c   : > { %v2829_v49 = vsub.f32 %v2825_v46, %v2828_v48 }
 0x72e   : > { %v2830_v50 = vmul.f32 1.442695, %v2829_v49 }
 0x72f   : > { %v2838_v27 = vpop.permute.xlu1 %2837 }
 0x730   : > { %4457 = vpow2.f32 %v2830_v50  ;;  %4288 = vmatpush3.msra.mxu1 %v2838_v27 }
 0x731   : > { %4297 = vmatprep.subr.mxu1 %v4651_v0 }
 0x733   : > { %v2914_v30 = vpop.permute.xlu1 %2913 }
 0x737   : > { %v3079_v35 = vpop.permute.xlu1 %3078 }
 0x73d   : > { %v4458_v51 = vpop.eup %4457 }
 0x73e   : > { %v2832_v52 = vsel %vm400_vm2, %v4458_v51, 0.0 }
 0x73f   : > { %2833 = vadd.xlane.f32.xlu0 %v2832_v52 }
 0x755   : > { %2915 = vrot.lane.b32.xlu0 %v4866_v15, %s4663_s19  ;;  %s4571_s19 = scalar_lea.vmem %s3845_s17, 128 }
 0x756   : > { %p4572_p4 = scmp.ne.s32.totalorder %s3845_s17, %s4571_s19 }
 0x758   : > { %p4573_p12 = pnand %p4572_p4, %p5288_p6 }
 0x759   : > { %3001 = vrot.lane.b32.xlu0 %v4888_v31, %s4662_s16  ;;  %v2996_v31 = vld [vmem:[#allocation7 + $0xd8] sm:$0xff] }
 0x75a   : > { %p4574_p0 = pneg %p4573_p12 }
 0x75d   : > { %3155 = vrot.lane.b32.xlu0 %v4988_v38, %s4662_s16  ;;  %v3233_v38 = vpop.permute.xlu1 %3232 }
 0x761   : > { %3309 = vrot.lane.b32.xlu0 %v4996_v47, %s4662_s16  ;;  %v3387_v57 = vpop.permute.xlu1 %3386 }
 0x765   : > { %3463 = vrot.lane.b32.xlu0 %v5005_v45, %s4662_s16  ;;  %v3541_v60 = vpop.permute.xlu1 %3540  ;;  %s3831_s16 = scalar_lea.sflag [#allocation4], %s4830_s7 }
 0x7c8   : > { %v2834_v33 = vpop.xlane.xlu0 %2833 }
 0x7c9   : > { %4459 = vrcp.f32 %v2834_v33 }
 0x7cc   : > { %v2916_v34 = vpop.permute.xlu0 %2915 }
 0x7cd   : > { %4293 = vmatpush3.xpose.msk.msra.mxu0 %vm400_vm2, %v2916_v34 }
 0x7ce   : > { %4302 = vmatprep.subr.mxu0 %v4651_v0 }
 0x7d0   : > { %4295 = vmatmul.mubr.msk.f32.vlgmr.msra.gmra.mxu0 %vm400_vm2, %v2914_v30  ;;  %v3002_v45 = vpop.permute.xlu0 %3001 }
 0x7d1   : > { %4303 = vmatpush3.xpose.msk.msra.mxu0 %vm400_vm2, %v2994_v53  ;;  %4304 = vmatprep.mubr.msk.f32.mxu0 %vm4652_vm0, %v4651_v0 }
 0x7d2   : > { %4312 = vmatprep.subr.mxu0 %v4651_v0 }
 0x7d4   : > { %4305 = vmatmul.mubr.msk.f32.vlgmr.msra.gmra.mxu0 %vm400_vm2, %v3079_v35  ;;  %v3156_v59 = vpop.permute.xlu0 %3155 }
 0x7d5   : > { %4313 = vmatpush3.xpose.msk.msra.mxu0 %vm400_vm2, %v2996_v31  ;;  %4314 = vmatprep.mubr.msk.f32.mxu0 %vm4652_vm0, %v4651_v0 }
 0x7d6   : > { %v4460_v47 = vpop.eup %4459  ;;  %4322 = vmatprep.subr.mxu0 %v4651_v0 }
 0x7d7   : > { %v2836_v55 = vmul.f32 %v4460_v47, %v4458_v51  ;;  %v3747_v47 = vld [vmem:[#allocation8 + $0x10] sm:$0xff] }
 0x7d8   : > { %4315 = vmatmul.mubr.msk.f32.vlgmr.msra.gmra.mxu0 %vm400_vm2, %v3233_v38  ;;  %v3310_v1 = vpop.permute.xlu0 %3309 }
 0x7d9   : > { %4290 = vmatmul.mubr.msk.f32.vlgmr.msra.gmra.mxu1 %vm400_vm2, %v2836_v55  ;;  %4323 = vmatpush3.xpose.msk.msra.mxu0 %vm400_vm2, %v2998_v54  ;;  %v3745_v54 = vld [vmem:[#allocation8] sm:$0xff] }
 0x7da   : > { %4298 = vmatpush3.xpose.msk.msra.mxu1 %vm400_vm2, %v2993_v56  ;;  %4324 = vmatprep.mubr.msk.f32.mxu0 %vm4652_vm0, %v4651_v0 }
 0x7db   : > { %4299 = vmatprep.mubr.msk.f32.mxu1 %vm4652_vm0, %v4651_v0  ;;  %4332 = vmatprep.subr.mxu0 %v4651_v0 }
 0x7dc   : > { %4325 = vmatmul.mubr.msk.f32.vlgmr.msra.gmra.mxu0 %vm400_vm2, %v3387_v57  ;;  %4307 = vmatprep.subr.mxu1 %v4651_v0  ;;  %v3464_v3 = vpop.permute.xlu0 %3463 }
 0x7dd   : > { %4300 = vmatmul.mubr.msk.f32.vlgmr.msra.gmra.mxu1 %vm400_vm2, %v3002_v45  ;;  %4333 = vmatpush3.xpose.msk.msra.mxu0 %vm400_vm2, %v3000_v58  ;;  %v3746_v45 = vld [vmem:[#allocation8 + $0x8] sm:$0xff] }
 0x7de   : > { %4308 = vmatpush3.xpose.msk.msra.mxu1 %vm400_vm2, %v2995_v44  ;;  %4334 = vmatprep.mubr.msk.f32.mxu0 %vm4652_vm0, %v4651_v0 }
 0x7df   : > { %4309 = vmatprep.mubr.msk.f32.mxu1 %vm4652_vm0, %v4651_v0  ;;  %4317 = vmatprep.subr.mxu1 %v4651_v0 }
 0x7e0   : > { %4335 = vmatmul.mubr.msk.f32.vlgmr.msra.gmra.mxu0 %vm400_vm2, %v3541_v60  ;;  %4342 = vmatprep.subr.mxu0 %v4651_v0  ;;  %v4035_v60 = vld [vmem:[%s5267_s5] ss:$0 sm:$0xff] }
 0x7e1   : > { %4310 = vmatmul.mubr.msk.f32.vlgmr.msra.gmra.mxu1 %vm400_vm2, %v3156_v59  ;;  %4350 = vmatprep.mubr.msk.f32.mxu0 %vm4652_vm0, %v4651_v0 }
 0x7e2   : > { %4318 = vmatpush3.xpose.msk.msra.mxu1 %vm400_vm2, %v2997_v63  ;;  %4319 = vmatprep.mubr.msk.f32.mxu1 %vm4652_vm0, %v4651_v0 }
 0x7e3   : > { %4327 = vmatprep.subr.mxu1 %v4651_v0 }
 0x7e5   : > { %4320 = vmatmul.mubr.msk.f32.vlgmr.msra.gmra.mxu1 %vm400_vm2, %v3310_v1 }
 0x7e6   : > { %4328 = vmatpush3.xpose.msk.msra.mxu1 %vm400_vm2, %v2999_v2  ;;  %4329 = vmatprep.mubr.msk.f32.mxu1 %vm4652_vm0, %v4651_v0 }
 0x7e7   : > { %4337 = vmatprep.subr.mxu1 %v4651_v0 }
 0x7e9   : > { %4330 = vmatmul.mubr.msk.f32.vlgmr.msra.gmra.mxu1 %vm400_vm2, %v3464_v3 }
 0x7ea   : > { %4339 = vmatprep.mubr.msk.f32.mxu1 %vm4652_vm0, %v4651_v0 }
 0x890   : > { %v2987_v4 = vpop.f32.mrf.mxu0 }
 0x891   : > { %v2991_v23 = vmul.f32 2.828427, %v2987_v4 }
 0x892   : > { %v4296_v5 = vpop.f32.mrf.mxu0 }
 0x894   : > { %v3151_v7 = vpop.f32.mrf.mxu0 }
 0x895   : > { %v3625_v21 = vrot.slane %v3151_v7, 7 }
 0x896   : > { %v4306_v8 = vpop.f32.mrf.mxu0 }
 0x898   : > { %v3305_v9 = vpop.f32.mrf.mxu0 }
 0x899   : > { %v2909_v10 = vpop.f32.mrf.mxu1  ;;  %v3629_v28 = vrot.slane %v3305_v9, 5 }
 0x89a   : > { %v4316_v11 = vpop.f32.mrf.mxu0 }
 0x89b   : > { %v4291_v13 = vpop.f32.mrf.mxu1 }
 0x89c   : > { %v3459_v16 = vpop.f32.mrf.mxu0 }
 0x89d   : > { %v3074_v17 = vpop.f32.mrf.mxu1  ;;  %v3633_v39 = vrot.slane %v3459_v16, 3 }
 0x89e   : > { %v4326_v18 = vpop.f32.mrf.mxu0  ;;  %v3626_v25 = vsel %vm1142_vm3, %v3625_v21, %v3074_v17 }
 0x89f   : > { %v4301_v19 = vpop.f32.mrf.mxu1 }
 0x8a0   : > { %v3613_v20 = vpop.f32.mrf.mxu0 }
 0x8a1   : > { %v3228_v22 = vpop.f32.mrf.mxu1  ;;  %v3637_v42 = vrot.slane %v3613_v20, 1 }
 0x8a2   : > { %v3627_v6 = vrot.slane %v3228_v22, 6  ;;  %v4336_v24 = vpop.f32.mrf.mxu0 }
 0x8a3   : > { %v4311_v14 = vpop.f32.mrf.mxu1 }
 0x8a4   : > { %v3628_v26 = vsel %vm1145_vm4, %v3627_v6, %v3626_v25 }
 0x8a5   : > { %v3382_v29 = vpop.f32.mrf.mxu1  ;;  %v3630_v61 = vsel %vm1148_vm5, %v3629_v28, %v3628_v26 }
 0x8a6   : > { %v3631_v32 = vrot.slane %v3382_v29, 4 }
 0x8a7   : > { %v4321_v36 = vpop.f32.mrf.mxu1 }
 0x8a8   : > { %v3632_v37 = vsel %vm1151_vm6, %v3631_v32, %v3630_v61 }
 0x8a9   : > { %v3536_v40 = vpop.f32.mrf.mxu1  ;;  %v3634_v43 = vsel %vm1154_vm7, %v3633_v39, %v3632_v37 }
 0x8aa   : > { %v3635_v41 = vrot.slane %v3536_v40, 2 }
 0x8ab   : > { %v4331_v46 = vpop.f32.mrf.mxu1 }
 0x8ac   : > { %v3636_v48 = vsel %vm1157_vm8, %v3635_v41, %v3634_v43 }
 0x8ad   : > { %v3638_v49 = vsel %vm1160_vm9, %v3637_v42, %v3636_v48 }
 0x8ae   : > { %v3640_v50 = vadd.f32 %v3638_v49, %v2991_v23 }
 0x8b0   : > { %v3641_v27 = vsel %vm400_vm2, %v3640_v50, -inf }
 0x8b1   : > { %3642 = vmax.xlane.f32.xlu0 %v3641_v27 }
 0x8c7   : > { %3652 = vrot.lane.b32.xlu0 %v4866_v15, %s4664_s8  ;;  %v3748_v15 = vld [vmem:[#allocation8 + $0x18] sm:$0xff]  ;;  %s4577_s8 = scalar_lea.vmem %s4576_s10, 256 }
 0x8c8   : > { %4343 = vmatpush3.msra.mxu0 %v3748_v15  ;;  %p4579_p3 = scmp.lt.s32.totalorder %s4577_s8, %s4571_s19 }
 0x8c9   : > { %4344 = vmatprep.subr.mxu0 %v4651_v0 }
 0x8ca   : > { %4345 = vmatpush3.msra.mxu0 %v3747_v47  ;;  %p4580_p7 = por %p4579_p3, %p4578_p5 }
 0x8cb   : > { %3733 = vrot.lane.b32.xlu0 %v2909_v10, %s4665_s1  ;;  %4346 = vmatprep.subr.mxu0 %v4651_v0 }
 0x8cc   : > { %4347 = vmatpush3.msra.mxu0 %v3746_v45  ;;  %p4581_p9 = pnand %p4580_p7, %p4574_p0 }
 0x8cd   : > { %4348 = vmatprep.subr.mxu0 %v4651_v0 }
 0x8ce   : > { %4349 = vmatpush3.msra.mxu0 %v3745_v54 }
 0x93a   : > { %v3643_v51 = vpop.xlane.xlu0 %3642 }
 0x93b   : > { %v3644_v52 = vsub.f32 %v3640_v50, %v3643_v51 }
 0x93d   : > { %v3645_v30 = vmul.f32 1.442695, %v3644_v52 }
 0x93e   : > { %v3653_v33 = vpop.permute.xlu0 %3652 }
 0x93f   : > { %4461 = vpow2.f32 %v3645_v30  ;;  %4338 = vmatpush3.msra.mxu1 %v3653_v33 }
 0x942   : > { %v3734_v58 = vpop.permute.xlu0 %3733 }
 0x94c   : > { %v4462_v34 = vpop.eup %4461 }
 0x94d   : > { %v3647_v35 = vsel %vm400_vm2, %v4462_v34, 0.0 }
 0x94e   : > { %3648 = vadd.xlane.f32.xlu1 %v3647_v35 }
 0x95f   : > { %3729 = vrot.lane.b32.xlu1 %v5126_v12, %s4666_s27 }
 0x9d7   : > { %v3649_v53 = vpop.xlane.xlu1 %3648 }
 0x9d8   : > { %4463 = vrcp.f32 %v3649_v53 }
 0x9db   : > { %v3730_v56 = vpop.permute.xlu1 %3729 }
 0x9dc   : > { %v3740_v57 = vsel %vm400_vm2, %v5047_v62, %v3730_v56 }
 0x9dd   : > { %v3742_v59 = vsel %vm3741_vm10, %v3740_v57, %v3734_v58 }
 0x9e5   : > { %v4464_v31 = vpop.eup %4463 }
 0x9e6   : > { %v3651_v38 = vmul.f32 %v4464_v31, %v4462_v34 }
 0x9e8   : > { %4340 = vmatmul.mubr.msk.f32.vlgmr.msra.gmra.mxu1 %vm400_vm2, %v3651_v38 }
 0xaa8   : > { %v3724_v12 = vpop.f32.mrf.mxu1 }
 0xaa9   : > { %3737 = vrot.lane.b32.xlu1 %v3724_v12, %s4667_s29 }
 0xaaa   : > { %v4341_v55 = vpop.f32.mrf.mxu1 }
 0xb1b   : > { %v3738_v44 = vpop.permute.xlu1 %3737 }
 0xb1c   : > { %v3744_v0 = vsel %vm3743_vm11, %v3742_v59, %v3738_v44 }
 0xb1d   : > { %4351 = vmatmul.mubr.msk.f32.vlgmr.msra.gmra.mxu0 %vm323_vm1, %v3744_v0 }
 0xbdd   : > { %v3825_v63 = vpop.f32.mrf.mxu0 }
 0xbde   : > { %v3826_v62 = vadd.f32 %v4035_v60, %v3825_v63 }
 0xbdf   : > { %v4352_v1 = vpop.f32.mrf.mxu0 }
 0xbe0   : > { %3829 = vst.msk [vmem:[%s310_s30] sm:$0xff] %vm323_vm1, %v3826_v62 }
 0xbe1   : > { %4584 = shalt.err (!%p4581_p9)
}
 0xbe2   : > { %s4585_s1 = scalar_lea.hbm %s5224_s15, 128  ;;  %s4589_s29 = scalar_lea.hbm %s5268_s6, 256 }
 0xbe3   : > { %p4586_p13 = scmp.ne.s32.totalorder %s5224_s15, %s4585_s1  ;;  %p4590_p11 = scmp.lt.s32.totalorder %s5224_s15, %s5268_s6 }
 0xbe4   : > { %p4591_p1 = scmp.lt.s32.totalorder %s4589_s29, %s4585_s1 }
 0xbe5   : > { %p4587_p10 = pnand %p4586_p13, %p5288_p6 }
 0xbe6   : > { %p4592_p2 = por %p4591_p1, %p4590_p11 }
 0xbe7   : > { %p4588_p8 = pneg %p4587_p10 }
 0xbe9   : > { %p4593_p4 = pnand %p4592_p2, %p4588_p8 }
 0xbeb   : > { %4596 = shalt.err (!%p4593_p4)
}
 0xbec   : > { %4367 = dma.vmem_to_hbm [thread:$0]  (%p5288_p6), %s3845_s17, 128, %s5224_s15, %s3831_s16  }
 0xbed PF: > { %s3856_s26 = sand.u32 1, %s4631_s21   ;;  %p5289_p12 = scmp.ne.s32.totalorder %s5275_s28, 0 }
 0xbee   : > { %p5290_p0 = scmp.ge.s32.totalorder %s4643_s24, 2  ;;  %s3857_s30 = scalar_lea.sflag [#allocation4], %s3856_s26 }
 0xbf0   : > { %p4384_p5 = pnand %p5290_p0, %p5289_p12 }
 0xbf2   : > { %p4385_p3 = pneg %p4384_p5 }
 0xbf4   : > { %4626 = dma.done.wait (%p4385_p3), %s3857_s30, 128  }
 0xbf5   : > { %4628 = vsyncadd (%p4385_p3), %s3857_s30, 4294967168  ;;  %p21_p7 = scmp.ge.s32.totalorder %s4784_s9, 4   ;;  %s5291_s21 = smov %s4635_s22 }
 0xbf6   : > { %s5292_s22 = smov %s4639_s23  ;;  %s5293_s23 = smov %s4794_s11 }
 0xbf7   : > { %s5294_s24 = smov %s4784_s9  ;;  %23 = sbr.rel (!%p21_p7) target bundleno = 9 (0x9), region = 104 }
 0xbfc   :  { %3862 = vsyncpa [#allocation3], 1 }
 0xbfd   :  { %3864 = vsyncpa [#allocation3 + $0x1], 1 }
 0xbfe   :  { %3865 = vsyncpa [#allocation6], 1 }
 0xbff   :  { %3866 = vsyncpa [#allocation9], 1 }
 0xc00   :  { %3867 = vsyncpa [#allocation4], 1 }
 0xc01   :  { %3869 = vsyncpa [#allocation4 + $0x1], 1 }

</bundles_post_ra>
